<compile_context>
chip_gen: v7x
topology: tpu7x:2x2x1
jax: 0.10.0
libtpu: 0.0.40
codegen_flags: <defaults>
</compile_context>

<pallas_src>
import numpy as np
import jax
import jax.numpy as jnp
from jax.experimental import pallas as pl
from jax.experimental.pallas import tpu as pltpu

# FATES-style constants referenced as globals in the PyTorch forward.
QUANT_EFF = 0.05
THETA_CJ = 0.999            # theta_cj_c3 == theta_cj_c4
THETA_IP = 0.999
H2O_CO2_BL_DIFFUSE_RATIO = 1.4
H2O_CO2_STOMA_DIFFUSE_RATIO = 1.6

# Parameter field indices (only the fields the forward actually reads;
# ceair / jmax / veg_esat / qabs from pre_fates are never used).
(P_PARSUN, P_C3C4, P_STOMA_INT, P_MM_KCO2, P_MM_KO2, P_CO2_CPOINT, P_GB_MOL,
 P_LMR, P_VCMAX, P_CO2_SLOPE, P_MEDLYN, P_O2, P_CAN_PRESS, P_LEAF_CO2,
 P_JE, P_LAI, P_VPD) = range(17)
NUM_PARAMS = 17

LANE = 128
SUBLANE = 8
MAX_TILE_ROWS = 1024   # 19 arrays * 1024*128*4B * 2 buffers ~= 19 MiB of VMEM


def _cdiv(a, b):
    return -(-a // b)


def _round_up(a, b):
    return _cdiv(a, b) * b


def _quad_min(a_const, b, c, xp):
    """Smaller root of a_const*x^2 + b*x + c with compile-time a_const > 0."""
    disc = xp.maximum(b * b - (4.0 * a_const) * c, 0.0)
    return (-b - xp.sqrt(disc)) * (0.5 / a_const)


def _residual(x, p, xp=jnp, full=False):
    """Elementwise FATES residual.  xp=jnp inside the kernel, xp=np (float64)
    for the reference.  `full=True` additionally returns the intermediates
    needed for the conditioning-aware tolerance in the test harness."""
    parsun = p[P_PARSUN]
    c3 = p[P_C3C4]
    stoma_int = p[P_STOMA_INT]
    mm_kco2 = p[P_MM_KCO2]
    mm_ko2 = p[P_MM_KO2]
    cp = p[P_CO2_CPOINT]
    gb = p[P_GB_MOL]
    lmr = p[P_LMR]
    vcmax = p[P_VCMAX]
    slope = p[P_CO2_SLOPE]
    medlyn = p[P_MEDLYN]
    o2 = p[P_O2]
    can_press = p[P_CAN_PRESS]
    leaf_co2 = p[P_LEAF_CO2]
    je = p[P_JE]
    lai = p[P_LAI]
    vpd = p[P_VPD]

    one_m_c3 = 1.0 - c3

    # Rubisco / RuBP / product-limited rates.
    x_m_cp = xp.maximum(x - cp, 0.0)
    ac = (vcmax * x_m_cp / (x + mm_kco2 * (1.0 + o2 / mm_ko2)) * c3
          + vcmax * one_m_c3)
    aj = (je * x_m_cp / (4.0 * x + 8.0 * cp) * c3
          + (QUANT_EFF * 4.6) * parsun * one_m_c3)
    ap = slope * xp.maximum(x, 0.0) / can_press

    # theta_cj_c3 == theta_cj_c4: the shared smaller root is computed once.
    root_cj = _quad_min(THETA_CJ, -(ac + aj), ac * aj, xp)
    ai = root_cj * one_m_c3
    agross = (root_cj * c3
              + _quad_min(THETA_IP, -(ai + ap), ai * ap, xp) * one_m_c3)
    anet = agross - lmr

    # LAI mask first, then parsun <= 0 overrides to -lmr (matches spec order).
    anet = xp.where(lai > 0.0, anet, 0.0)
    anet = xp.where(parsun <= 0.0, -lmr, anet)

    leaf_co2c = xp.maximum(leaf_co2, 1e-6)
    can_co2 = xp.maximum(
        leaf_co2c + H2O_CO2_BL_DIFFUSE_RATIO / gb * anet * can_press, 1e-6)
    term = H2O_CO2_STOMA_DIFFUSE_RATIO * anet * can_press / leaf_co2c

    # aquad == 1.0 (compile-time constant); discriminant computed once and
    # reused for both the branch mask and the larger root.
    mt = medlyn * term
    bquad = -(2.0 * (stoma_int + term) + mt * mt / (gb * vpd))
    cquad = (stoma_int * stoma_int
             + (2.0 * stoma_int + term * (1.0 - medlyn * medlyn / vpd)) * term)
    disc = bquad * bquad - 4.0 * cquad
    gs_root = (-bquad + xp.sqrt(xp.maximum(disc, 0.0))) * 0.5
    take_int = (anet < 0.0) | (disc < 0.0)
    gs = xp.where(take_int, stoma_int, gs_root)

    def resid(gs_mol):
        return x - (can_co2 - anet * can_press
                    * (H2O_CO2_BL_DIFFUSE_RATIO * gs_mol
                       + H2O_CO2_STOMA_DIFFUSE_RATIO * gb)
                    / (gb * gs_mol))

    f = resid(gs)
    if not full:
        return f

    aux = dict(ac=ac, aj=aj, ap=ap, ai=ai, anet=anet, can_co2=can_co2,
               term=term, bquad=bquad, cquad=cquad, disc=disc, gs=gs,
               f_int=resid(stoma_int),
               f_root=resid(xp.maximum(gs_root, 1e-30)))
    return f, aux


# ----------------------------- Pallas kernel --------------------------------
def newton_kernel(*refs):
    x_ref = refs[0]
    p_refs = refs[1:1 + NUM_PARAMS]
    f_ref = refs[1 + NUM_PARAMS]
    x = x_ref[...]                      # (tile_rows, LANE)
    params = [r[...] for r in p_refs]   # each (tile_rows, LANE)
    f_ref[...] = _residual(x, params, xp=jnp)


def model_equations_forward(x, params, *, max_tile_rows=MAX_TILE_ROWS):
    """x: (B,C,H,W) f32; params: sequence of NUM_PARAMS arrays, same shape.
    Returns f with the same shape/dtype as x."""
    assert len(params) == NUM_PARAMS
    orig_shape = x.shape
    orig_dtype = x.dtype
    n = x.size

    rows = _cdiv(n, LANE)
    padded_rows = _round_up(max(rows, SUBLANE), SUBLANE)  # sublane-align only
    total = padded_rows * LANE

    # Cap the tile so the grid has >= 2 steps when possible (v7x: 2 TCs can
    # each take a "parallel" share); never exceed MAX_TILE_ROWS (VMEM budget).
    if padded_rows >= 2 * SUBLANE:
        tile = min(max_tile_rows, _round_up(_cdiv(padded_rows, 2), SUBLANE))
    else:
        tile = padded_rows
    grid = _cdiv(padded_rows, tile)     # ragged last block handled by Pallas

    def to2d(a):
        flat = a.reshape(-1)
        if flat.dtype != jnp.float32:
            flat = flat.astype(jnp.float32)
        if total != n:
            # Benign padding (1.0 avoids zero denominators); only up to the
            # next sublane multiple and sliced off below.
            flat = jnp.pad(flat, (0, total - n), constant_values=1.0)
        return flat.reshape(padded_rows, LANE)

    x2 = to2d(x)
    p2 = [to2d(p) for p in params]

    spec = pl.BlockSpec((tile, LANE), lambda i: (i, 0))
    f = pl.pallas_call(
        newton_kernel,
        out_shape=jax.ShapeDtypeStruct((padded_rows, LANE), jnp.float32),
        grid=(grid,),
        in_specs=[spec] * (1 + NUM_PARAMS),
        out_specs=spec,
        compiler_params=pltpu.CompilerParams(
            dimension_semantics=("parallel",),
            vmem_limit_bytes=40 * 1024 * 1024,   # < v7x 64 MiB per-core cap
        ),
    )(x2, *p2)

    f = f.reshape(-1)[:n].reshape(orig_shape)
    return f.astype(orig_dtype)


# ------------------------ synthetic pre_fates stand-in ----------------------
def _make_synthetic_prefates(key, shape):
    """Deterministic, physically-plausible stand-in for pre_fates outputs."""
    ks = jax.random.split(key, NUM_PARAMS)

    def u(k, lo, hi):
        return jax.random.uniform(k, shape, jnp.float32, lo, hi)

    fields = [None] * NUM_PARAMS
    fields[P_PARSUN] = u(ks[0], -50.0, 500.0)          # some <= 0 -> mask path
    fields[P_C3C4] = jax.random.bernoulli(ks[1], 0.7, shape).astype(jnp.float32)
    fields[P_STOMA_INT] = u(ks[2], 8000.0, 12000.0)
    fields[P_MM_KCO2] = u(ks[3], 30.0, 50.0)
    fields[P_MM_KO2] = u(ks[4], 25000.0, 30000.0)
    fields[P_CO2_CPOINT] = u(ks[5], 3.0, 6.0)
    fields[P_GB_MOL] = u(ks[6], 1.0, 3.0)
    fields[P_LMR] = u(ks[7], 0.5, 2.0)
    fields[P_VCMAX] = u(ks[8], 30.0, 80.0)
    fields[P_CO2_SLOPE] = u(ks[9], 1000.0, 5000.0)
    fields[P_MEDLYN] = u(ks[10], 2.0, 6.0)
    fields[P_O2] = u(ks[11], 20000.0, 22000.0)
    fields[P_CAN_PRESS] = u(ks[12], 90000.0, 101325.0)
    fields[P_LEAF_CO2] = u(ks[13], 20.0, 60.0)
    fields[P_JE] = u(ks[14], 50.0, 200.0)
    fields[P_LAI] = u(ks[15], -1.0, 5.0)               # some <= 0 -> mask path
    fields[P_VPD] = u(ks[16], 0.5, 3.0)
    return fields


if __name__ == "__main__":
    key = jax.random.PRNGKey(0)
    k_params, k_x = jax.random.split(key)

    shape = (2, 4, 16, 16)  # NCHW, flattens to 16 rows x 128 lanes
    params = _make_synthetic_prefates(k_params, shape)
    x = jax.random.uniform(k_x, shape, jnp.float32, 10.0, 60.0)  # CO2 ppress (Pa)

    f = model_equations_forward(x, params)
    f = jax.block_until_ready(f)

    # ---- float64 numpy reference of the identical math ---------------------
    # The residual subtracts near-cancelling O(1e5-1e7) intermediates, and
    # anet feeds it through a sensitivity of ~can_press*2.8/gb (~1e5), so the
    # tolerance must be derived from the f32 conditioning, not a flat rel-tol.
    x64 = np.asarray(x, dtype=np.float64)
    p64 = [np.asarray(p, dtype=np.float64) for p in params]
    f64, aux = _residual(x64, p64, xp=np, full=True)

    eps = float(np.finfo(np.float32).eps)
    ac, aj, ap, ai = aux["ac"], aux["aj"], aux["ap"], aux["ai"]
    anet, can_co2, gs = aux["anet"], aux["can_co2"], aux["gs"]
    gb = p64[P_GB_MOL]
    can_press = p64[P_CAN_PRESS]
    stoma = p64[P_STOMA_INT]
    lmr = p64[P_LMR]
    c3 = p64[P_C3C4]

    def minroot_err(u, v, eu, ev, theta):
        # Upper bound on the f32 error of the smaller quadratic root given
        # absolute input errors (eu, ev); includes the sqrt(disc) cancellation
        # amplification when u ~= v and theta ~= 1.
        s = np.abs(u) + np.abs(v) + 1e-30
        disc = np.maximum((u + v) ** 2 - 4.0 * theta * u * v, 1e-300)
        derr = 2.0 * s * (eu + ev) + 2.0 * eps * s * s
        return (eu + ev) + eps * s + derr / (2.0 * np.sqrt(disc))

    e_ac = 4.0 * eps * (np.abs(ac) + 1.0)
    e_aj = 4.0 * eps * (np.abs(aj) + 1.0)
    e_ap = 4.0 * eps * (np.abs(ap) + 1.0)
    e_cj = minroot_err(ac, aj, e_ac, e_aj, THETA_CJ)
    e_ip = minroot_err(ai, ap, e_cj, e_ap, THETA_IP)
    e_anet = c3 * e_cj + (1.0 - c3) * e_ip + 2.0 * eps * (np.abs(lmr) + 1.0)

    # |df/danet| bound: anet enters f through both can_co2 and the flux term.
    sens_anet = (can_press * (1.4 * gs + 1.6 * gb) / (gb * gs)
                 + 1.4 * can_press / gb)
    t_mag = np.abs(anet) * can_press * (1.4 * gs + 1.6 * gb) / (gb * gs)
    tol = (1e-2
           + 8.0 * eps * (np.abs(x64) + np.abs(can_co2) + t_mag + stoma)
           + 4.0 * sens_anet * e_anet)

    fk = np.asarray(f, dtype=np.float64)
    diff = np.abs(fk - f64)

    # Branch-flip handling: near the gs_mol decision boundary (anet ~ 0 or
    # discriminant ~ 0) f32 rounding can legitimately pick the other branch;
    # accept agreement with either branch's residual there.
    bq, cq, disc = aux["bquad"], aux["cquad"], aux["disc"]
    rel_anet = e_anet / (np.abs(anet) + 1e-30)
    near = ((np.abs(anet) <= 8.0 * e_anet + 1e-6)
            | (np.abs(disc) <= (bq * bq + np.abs(4.0 * cq) + 1.0)
               * (8.0 * rel_anet + 64.0 * eps)))
    diff_alt = np.minimum(np.abs(fk - aux["f_int"]), np.abs(fk - aux["f_root"]))
    ok = (diff <= tol) | (near & (diff_alt <= tol))

    assert np.isfinite(fk).all(), "kernel produced non-finite values"
    assert bool(ok.all()), (
        f"max|diff|={float(diff.max())}, worst tol={float(tol[diff.argmax()])}")
    assert float(np.median(diff)) <= 5.0, (
        f"median diff {float(np.median(diff))} too large")

    print("KERNEL_OK")
</pallas_src>

<mosaic_0001>
module attributes {stable_mosaic.version = 11 : i64} {
  func.func @newton_kernel(%arg0: i32, %arg1: memref<8x128xf32, #tpu.memory_space<vmem>>, %arg2: memref<8x128xf32, #tpu.memory_space<vmem>>, %arg3: memref<8x128xf32, #tpu.memory_space<vmem>>, %arg4: memref<8x128xf32, #tpu.memory_space<vmem>>, %arg5: memref<8x128xf32, #tpu.memory_space<vmem>>, %arg6: memref<8x128xf32, #tpu.memory_space<vmem>>, %arg7: memref<8x128xf32, #tpu.memory_space<vmem>>, %arg8: memref<8x128xf32, #tpu.memory_space<vmem>>, %arg9: memref<8x128xf32, #tpu.memory_space<vmem>>, %arg10: memref<8x128xf32, #tpu.memory_space<vmem>>, %arg11: memref<8x128xf32, #tpu.memory_space<vmem>>, %arg12: memref<8x128xf32, #tpu.memory_space<vmem>>, %arg13: memref<8x128xf32, #tpu.memory_space<vmem>>, %arg14: memref<8x128xf32, #tpu.memory_space<vmem>>, %arg15: memref<8x128xf32, #tpu.memory_space<vmem>>, %arg16: memref<8x128xf32, #tpu.memory_space<vmem>>, %arg17: memref<8x128xf32, #tpu.memory_space<vmem>>, %arg18: memref<8x128xf32, #tpu.memory_space<vmem>>, %arg19: memref<8x128xf32, #tpu.memory_space<vmem>>) attributes {dimension_semantics = [#tpu.dimension_semantics<parallel>], iteration_bounds = array<i64: 2>, scalar_prefetch = 0 : i64, scratch_operands = 0 : i64, tpu.core_type = #tpu.core_type<tc>, window_params = [{transform_indices = @transform_0, window_bounds = array<i64: 8, 128>}, {transform_indices = @transform_1, window_bounds = array<i64: 8, 128>}, {transform_indices = @transform_2, window_bounds = array<i64: 8, 128>}, {transform_indices = @transform_3, window_bounds = array<i64: 8, 128>}, {transform_indices = @transform_4, window_bounds = array<i64: 8, 128>}, {transform_indices = @transform_5, window_bounds = array<i64: 8, 128>}, {transform_indices = @transform_6, window_bounds = array<i64: 8, 128>}, {transform_indices = @transform_7, window_bounds = array<i64: 8, 128>}, {transform_indices = @transform_8, window_bounds = array<i64: 8, 128>}, {transform_indices = @transform_9, window_bounds = array<i64: 8, 128>}, {transform_indices = @transform_10, window_bounds = array<i64: 8, 128>}, {transform_indices = @transform_11, window_bounds = array<i64: 8, 128>}, {transform_indices = @transform_12, window_bounds = array<i64: 8, 128>}, {transform_indices = @transform_13, window_bounds = array<i64: 8, 128>}, {transform_indices = @transform_14, window_bounds = array<i64: 8, 128>}, {transform_indices = @transform_15, window_bounds = array<i64: 8, 128>}, {transform_indices = @transform_16, window_bounds = array<i64: 8, 128>}, {transform_indices = @transform_17, window_bounds = array<i64: 8, 128>}, {transform_indices = @transform_18, window_bounds = array<i64: 8, 128>}]} {
    %c0 = arith.constant 0 : index
    %c0_0 = arith.constant 0 : index
    %0 = vector.load %arg1[%c0, %c0_0] : memref<8x128xf32, #tpu.memory_space<vmem>>, vector<8x128xf32>
    %c0_1 = arith.constant 0 : index
    %c0_2 = arith.constant 0 : index
    %1 = vector.load %arg2[%c0_1, %c0_2] : memref<8x128xf32, #tpu.memory_space<vmem>>, vector<8x128xf32>
    %c0_3 = arith.constant 0 : index
    %c0_4 = arith.constant 0 : index
    %2 = vector.load %arg3[%c0_3, %c0_4] : memref<8x128xf32, #tpu.memory_space<vmem>>, vector<8x128xf32>
    %c0_5 = arith.constant 0 : index
    %c0_6 = arith.constant 0 : index
    %3 = vector.load %arg4[%c0_5, %c0_6] : memref<8x128xf32, #tpu.memory_space<vmem>>, vector<8x128xf32>
    %c0_7 = arith.constant 0 : index
    %c0_8 = arith.constant 0 : index
    %4 = vector.load %arg5[%c0_7, %c0_8] : memref<8x128xf32, #tpu.memory_space<vmem>>, vector<8x128xf32>
    %c0_9 = arith.constant 0 : index
    %c0_10 = arith.constant 0 : index
    %5 = vector.load %arg6[%c0_9, %c0_10] : memref<8x128xf32, #tpu.memory_space<vmem>>, vector<8x128xf32>
    %c0_11 = arith.constant 0 : index
    %c0_12 = arith.constant 0 : index
    %6 = vector.load %arg7[%c0_11, %c0_12] : memref<8x128xf32, #tpu.memory_space<vmem>>, vector<8x128xf32>
    %c0_13 = arith.constant 0 : index
    %c0_14 = arith.constant 0 : index
    %7 = vector.load %arg8[%c0_13, %c0_14] : memref<8x128xf32, #tpu.memory_space<vmem>>, vector<8x128xf32>
    %c0_15 = arith.constant 0 : index
    %c0_16 = arith.constant 0 : index
    %8 = vector.load %arg9[%c0_15, %c0_16] : memref<8x128xf32, #tpu.memory_space<vmem>>, vector<8x128xf32>
    %c0_17 = arith.constant 0 : index
    %c0_18 = arith.constant 0 : index
    %9 = vector.load %arg10[%c0_17, %c0_18] : memref<8x128xf32, #tpu.memory_space<vmem>>, vector<8x128xf32>
    %c0_19 = arith.constant 0 : index
    %c0_20 = arith.constant 0 : index
    %10 = vector.load %arg11[%c0_19, %c0_20] : memref<8x128xf32, #tpu.memory_space<vmem>>, vector<8x128xf32>
    %c0_21 = arith.constant 0 : index
    %c0_22 = arith.constant 0 : index
    %11 = vector.load %arg12[%c0_21, %c0_22] : memref<8x128xf32, #tpu.memory_space<vmem>>, vector<8x128xf32>
    %c0_23 = arith.constant 0 : index
    %c0_24 = arith.constant 0 : index
    %12 = vector.load %arg13[%c0_23, %c0_24] : memref<8x128xf32, #tpu.memory_space<vmem>>, vector<8x128xf32>
    %c0_25 = arith.constant 0 : index
    %c0_26 = arith.constant 0 : index
    %13 = vector.load %arg14[%c0_25, %c0_26] : memref<8x128xf32, #tpu.memory_space<vmem>>, vector<8x128xf32>
    %c0_27 = arith.constant 0 : index
    %c0_28 = arith.constant 0 : index
    %14 = vector.load %arg15[%c0_27, %c0_28] : memref<8x128xf32, #tpu.memory_space<vmem>>, vector<8x128xf32>
    %c0_29 = arith.constant 0 : index
    %c0_30 = arith.constant 0 : index
    %15 = vector.load %arg16[%c0_29, %c0_30] : memref<8x128xf32, #tpu.memory_space<vmem>>, vector<8x128xf32>
    %c0_31 = arith.constant 0 : index
    %c0_32 = arith.constant 0 : index
    %16 = vector.load %arg17[%c0_31, %c0_32] : memref<8x128xf32, #tpu.memory_space<vmem>>, vector<8x128xf32>
    %c0_33 = arith.constant 0 : index
    %c0_34 = arith.constant 0 : index
    %17 = vector.load %arg18[%c0_33, %c0_34] : memref<8x128xf32, #tpu.memory_space<vmem>>, vector<8x128xf32>
    %cst = arith.constant 1.000000e+00 : f32
    %18 = vector.broadcast %cst : f32 to vector<8x128xf32>
    %19 = arith.subf %18, %2 : vector<8x128xf32>
    %20 = arith.subf %0, %6 : vector<8x128xf32>
    %cst_35 = arith.constant 0.000000e+00 : f32
    %21 = vector.broadcast %cst_35 : f32 to vector<8x128xf32>
    %22 = arith.maximumf %20, %21 : vector<8x128xf32>
    %23 = arith.mulf %9, %22 : vector<8x128xf32>
    %24 = arith.divf %12, %5 : vector<8x128xf32>
    %cst_36 = arith.constant 1.000000e+00 : f32
    %25 = vector.broadcast %cst_36 : f32 to vector<8x128xf32>
    %26 = arith.addf %25, %24 : vector<8x128xf32>
    %27 = arith.mulf %4, %26 : vector<8x128xf32>
    %28 = arith.addf %0, %27 : vector<8x128xf32>
    %29 = arith.divf %23, %28 : vector<8x128xf32>
    %30 = arith.mulf %29, %2 : vector<8x128xf32>
    %31 = arith.mulf %9, %19 : vector<8x128xf32>
    %32 = arith.addf %30, %31 : vector<8x128xf32>
    %33 = arith.mulf %15, %22 : vector<8x128xf32>
    %cst_37 = arith.constant 4.000000e+00 : f32
    %34 = vector.broadcast %cst_37 : f32 to vector<8x128xf32>
    %35 = arith.mulf %34, %0 : vector<8x128xf32>
    %cst_38 = arith.constant 8.000000e+00 : f32
    %36 = vector.broadcast %cst_38 : f32 to vector<8x128xf32>
    %37 = arith.mulf %36, %6 : vector<8x128xf32>
    %38 = arith.addf %35, %37 : vector<8x128xf32>
    %39 = arith.divf %33, %38 : vector<8x128xf32>
    %40 = arith.mulf %39, %2 : vector<8x128xf32>
    %cst_39 = arith.constant 2.300000e-01 : f32
    %41 = vector.broadcast %cst_39 : f32 to vector<8x128xf32>
    %42 = arith.mulf %41, %1 : vector<8x128xf32>
    %43 = arith.mulf %42, %19 : vector<8x128xf32>
    %44 = arith.addf %40, %43 : vector<8x128xf32>
    %cst_40 = arith.constant 0.000000e+00 : f32
    %45 = vector.broadcast %cst_40 : f32 to vector<8x128xf32>
    %46 = arith.maximumf %0, %45 : vector<8x128xf32>
    %47 = arith.mulf %10, %46 : vector<8x128xf32>
    %48 = arith.divf %47, %13 : vector<8x128xf32>
    %49 = arith.addf %32, %44 : vector<8x128xf32>
    %cst_41 = arith.constant 0.000000e+00 : f32
    %50 = vector.broadcast %cst_41 : f32 to vector<8x128xf32>
    %51 = arith.subf %50, %49 : vector<8x128xf32>
    %52 = arith.mulf %32, %44 : vector<8x128xf32>
    %53 = arith.mulf %51, %51 : vector<8x128xf32>
    %cst_42 = arith.constant 3.996000e+00 : f32
    %54 = vector.broadcast %cst_42 : f32 to vector<8x128xf32>
    %55 = arith.mulf %54, %52 : vector<8x128xf32>
    %56 = arith.subf %53, %55 : vector<8x128xf32>
    %cst_43 = arith.constant 0.000000e+00 : f32
    %57 = vector.broadcast %cst_43 : f32 to vector<8x128xf32>
    %58 = arith.maximumf %56, %57 : vector<8x128xf32>
    %cst_44 = arith.constant 0.000000e+00 : f32
    %59 = vector.broadcast %cst_44 : f32 to vector<8x128xf32>
    %60 = arith.subf %59, %51 : vector<8x128xf32>
    %61 = math.sqrt %58 : vector<8x128xf32>
    %62 = arith.subf %60, %61 : vector<8x128xf32>
    %cst_45 = arith.constant 0.5005005 : f32
    %63 = vector.broadcast %cst_45 : f32 to vector<8x128xf32>
    %64 = arith.mulf %62, %63 : vector<8x128xf32>
    %65 = arith.mulf %64, %19 : vector<8x128xf32>
    %66 = arith.mulf %64, %2 : vector<8x128xf32>
    %67 = arith.addf %65, %48 : vector<8x128xf32>
    %cst_46 = arith.constant 0.000000e+00 : f32
    %68 = vector.broadcast %cst_46 : f32 to vector<8x128xf32>
    %69 = arith.subf %68, %67 : vector<8x128xf32>
    %70 = arith.mulf %65, %48 : vector<8x128xf32>
    %71 = arith.mulf %69, %69 : vector<8x128xf32>
    %cst_47 = arith.constant 3.996000e+00 : f32
    %72 = vector.broadcast %cst_47 : f32 to vector<8x128xf32>
    %73 = arith.mulf %72, %70 : vector<8x128xf32>
    %74 = arith.subf %71, %73 : vector<8x128xf32>
    %cst_48 = arith.constant 0.000000e+00 : f32
    %75 = vector.broadcast %cst_48 : f32 to vector<8x128xf32>
    %76 = arith.maximumf %74, %75 : vector<8x128xf32>
    %cst_49 = arith.constant 0.000000e+00 : f32
    %77 = vector.broadcast %cst_49 : f32 to vector<8x128xf32>
    %78 = arith.subf %77, %69 : vector<8x128xf32>
    %79 = math.sqrt %76 : vector<8x128xf32>
    %80 = arith.subf %78, %79 : vector<8x128xf32>
    %cst_50 = arith.constant 0.5005005 : f32
    %81 = vector.broadcast %cst_50 : f32 to vector<8x128xf32>
    %82 = arith.mulf %80, %81 : vector<8x128xf32>
    %83 = arith.mulf %82, %19 : vector<8x128xf32>
    %84 = arith.addf %66, %83 : vector<8x128xf32>
    %85 = arith.subf %84, %8 : vector<8x128xf32>
    %cst_51 = arith.constant 0.000000e+00 : f32
    %86 = vector.broadcast %cst_51 : f32 to vector<8x128xf32>
    %87 = arith.cmpf ogt, %16, %86 : vector<8x128xf32>
    %cst_52 = arith.constant 0.000000e+00 : f32
    %88 = vector.broadcast %cst_52 : f32 to vector<8x128xf32>
    %89 = arith.select %87, %85, %88 : vector<8x128xi1>, vector<8x128xf32>
    %cst_53 = arith.constant 0.000000e+00 : f32
    %90 = vector.broadcast %cst_53 : f32 to vector<8x128xf32>
    %91 = arith.cmpf ole, %1, %90 : vector<8x128xf32>
    %cst_54 = arith.constant 0.000000e+00 : f32
    %92 = vector.broadcast %cst_54 : f32 to vector<8x128xf32>
    %93 = arith.subf %92, %8 : vector<8x128xf32>
    %94 = arith.select %91, %93, %89 : vector<8x128xi1>, vector<8x128xf32>
    %cst_55 = arith.constant 9.99999997E-7 : f32
    %95 = vector.broadcast %cst_55 : f32 to vector<8x128xf32>
    %96 = arith.maximumf %14, %95 : vector<8x128xf32>
    %cst_56 = arith.constant 1.400000e+00 : f32
    %97 = vector.broadcast %cst_56 : f32 to vector<8x128xf32>
    %98 = arith.divf %97, %7 : vector<8x128xf32>
    %99 = arith.mulf %98, %94 : vector<8x128xf32>
    %100 = arith.mulf %99, %13 : vector<8x128xf32>
    %101 = arith.addf %96, %100 : vector<8x128xf32>
    %cst_57 = arith.constant 9.99999997E-7 : f32
    %102 = vector.broadcast %cst_57 : f32 to vector<8x128xf32>
    %103 = arith.maximumf %101, %102 : vector<8x128xf32>
    %cst_58 = arith.constant 1.600000e+00 : f32
    %104 = vector.broadcast %cst_58 : f32 to vector<8x128xf32>
    %105 = arith.mulf %104, %94 : vector<8x128xf32>
    %106 = arith.mulf %105, %13 : vector<8x128xf32>
    %107 = arith.divf %106, %96 : vector<8x128xf32>
    %108 = arith.mulf %11, %107 : vector<8x128xf32>
    %109 = arith.addf %3, %107 : vector<8x128xf32>
    %cst_59 = arith.constant 2.000000e+00 : f32
    %110 = vector.broadcast %cst_59 : f32 to vector<8x128xf32>
    %111 = arith.mulf %110, %109 : vector<8x128xf32>
    %112 = arith.mulf %108, %108 : vector<8x128xf32>
    %113 = arith.mulf %7, %17 : vector<8x128xf32>
    %114 = arith.divf %112, %113 : vector<8x128xf32>
    %115 = arith.addf %111, %114 : vector<8x128xf32>
    %cst_60 = arith.constant 0.000000e+00 : f32
    %116 = vector.broadcast %cst_60 : f32 to vector<8x128xf32>
    %117 = arith.subf %116, %115 : vector<8x128xf32>
    %118 = arith.mulf %3, %3 : vector<8x128xf32>
    %cst_61 = arith.constant 2.000000e+00 : f32
    %119 = vector.broadcast %cst_61 : f32 to vector<8x128xf32>
    %120 = arith.mulf %119, %3 : vector<8x128xf32>
    %121 = arith.mulf %11, %11 : vector<8x128xf32>
    %122 = arith.divf %121, %17 : vector<8x128xf32>
    %cst_62 = arith.constant 1.000000e+00 : f32
    %123 = vector.broadcast %cst_62 : f32 to vector<8x128xf32>
    %124 = arith.subf %123, %122 : vector<8x128xf32>
    %125 = arith.mulf %107, %124 : vector<8x128xf32>
    %126 = arith.addf %120, %125 : vector<8x128xf32>
    %127 = arith.mulf %126, %107 : vector<8x128xf32>
    %128 = arith.addf %118, %127 : vector<8x128xf32>
    %129 = arith.mulf %117, %117 : vector<8x128xf32>
    %cst_63 = arith.constant 4.000000e+00 : f32
    %130 = vector.broadcast %cst_63 : f32 to vector<8x128xf32>
    %131 = arith.mulf %130, %128 : vector<8x128xf32>
    %132 = arith.subf %129, %131 : vector<8x128xf32>
    %cst_64 = arith.constant 0.000000e+00 : f32
    %133 = vector.broadcast %cst_64 : f32 to vector<8x128xf32>
    %134 = arith.subf %133, %117 : vector<8x128xf32>
    %cst_65 = arith.constant 0.000000e+00 : f32
    %135 = vector.broadcast %cst_65 : f32 to vector<8x128xf32>
    %136 = arith.maximumf %132, %135 : vector<8x128xf32>
    %137 = math.sqrt %136 : vector<8x128xf32>
    %138 = arith.addf %134, %137 : vector<8x128xf32>
    %cst_66 = arith.constant 5.000000e-01 : f32
    %139 = vector.broadcast %cst_66 : f32 to vector<8x128xf32>
    %140 = arith.mulf %138, %139 : vector<8x128xf32>
    %cst_67 = arith.constant 0.000000e+00 : f32
    %141 = vector.broadcast %cst_67 : f32 to vector<8x128xf32>
    %142 = arith.cmpf olt, %94, %141 : vector<8x128xf32>
    %cst_68 = arith.constant 0.000000e+00 : f32
    %143 = vector.broadcast %cst_68 : f32 to vector<8x128xf32>
    %144 = arith.cmpf olt, %132, %143 : vector<8x128xf32>
    %145 = arith.ori %142, %144 : vector<8x128xi1>
    %146 = arith.select %145, %3, %140 : vector<8x128xi1>, vector<8x128xf32>
    %147 = arith.mulf %94, %13 : vector<8x128xf32>
    %cst_69 = arith.constant 1.400000e+00 : f32
    %148 = vector.broadcast %cst_69 : f32 to vector<8x128xf32>
    %149 = arith.mulf %148, %146 : vector<8x128xf32>
    %cst_70 = arith.constant 1.600000e+00 : f32
    %150 = vector.broadcast %cst_70 : f32 to vector<8x128xf32>
    %151 = arith.mulf %150, %7 : vector<8x128xf32>
    %152 = arith.addf %149, %151 : vector<8x128xf32>
    %153 = arith.mulf %147, %152 : vector<8x128xf32>
    %154 = arith.mulf %7, %146 : vector<8x128xf32>
    %155 = arith.divf %153, %154 : vector<8x128xf32>
    %156 = arith.subf %103, %155 : vector<8x128xf32>
    %157 = arith.subf %0, %156 : vector<8x128xf32>
    %c0_71 = arith.constant 0 : index
    %c0_72 = arith.constant 0 : index
    %158 = vector.load %arg19[%c0_71, %c0_72] : memref<8x128xf32, #tpu.memory_space<vmem>>, vector<8x128xf32>
    tpu.vector_store %arg19[%c0_71, %c0_72], %157 {strides = array<i32>} : memref<8x128xf32, #tpu.memory_space<vmem>>, vector<8x128xf32>,
    return
  }
  func.func @transform_0(%arg0: i32) -> (i32, i32) {
    %c0_i32 = arith.constant 0 : i32
    %c0_i32_0 = arith.constant 0 : i32
    return %arg0, %c0_i32 : i32, i32
  }
  func.func @transform_1(%arg0: i32) -> (i32, i32) {
    %c0_i32 = arith.constant 0 : i32
    %c0_i32_0 = arith.constant 0 : i32
    return %arg0, %c0_i32 : i32, i32
  }
  func.func @transform_2(%arg0: i32) -> (i32, i32) {
    %c0_i32 = arith.constant 0 : i32
    %c0_i32_0 = arith.constant 0 : i32
    return %arg0, %c0_i32 : i32, i32
  }
  func.func @transform_3(%arg0: i32) -> (i32, i32) {
    %c0_i32 = arith.constant 0 : i32
    %c0_i32_0 = arith.constant 0 : i32
    return %arg0, %c0_i32 : i32, i32
  }
  func.func @transform_4(%arg0: i32) -> (i32, i32) {
    %c0_i32 = arith.constant 0 : i32
    %c0_i32_0 = arith.constant 0 : i32
    return %arg0, %c0_i32 : i32, i32
  }
  func.func @transform_5(%arg0: i32) -> (i32, i32) {
    %c0_i32 = arith.constant 0 : i32
    %c0_i32_0 = arith.constant 0 : i32
    return %arg0, %c0_i32 : i32, i32
  }
  func.func @transform_6(%arg0: i32) -> (i32, i32) {
    %c0_i32 = arith.constant 0 : i32
    %c0_i32_0 = arith.constant 0 : i32
    return %arg0, %c0_i32 : i32, i32
  }
  func.func @transform_7(%arg0: i32) -> (i32, i32) {
    %c0_i32 = arith.constant 0 : i32
    %c0_i32_0 = arith.constant 0 : i32
    return %arg0, %c0_i32 : i32, i32
  }
  func.func @transform_8(%arg0: i32) -> (i32, i32) {
    %c0_i32 = arith.constant 0 : i32
    %c0_i32_0 = arith.constant 0 : i32
    return %arg0, %c0_i32 : i32, i32
  }
  func.func @transform_9(%arg0: i32) -> (i32, i32) {
    %c0_i32 = arith.constant 0 : i32
    %c0_i32_0 = arith.constant 0 : i32
    return %arg0, %c0_i32 : i32, i32
  }
  func.func @transform_10(%arg0: i32) -> (i32, i32) {
    %c0_i32 = arith.constant 0 : i32
    %c0_i32_0 = arith.constant 0 : i32
    return %arg0, %c0_i32 : i32, i32
  }
  func.func @transform_11(%arg0: i32) -> (i32, i32) {
    %c0_i32 = arith.constant 0 : i32
    %c0_i32_0 = arith.constant 0 : i32
    return %arg0, %c0_i32 : i32, i32
  }
  func.func @transform_12(%arg0: i32) -> (i32, i32) {
    %c0_i32 = arith.constant 0 : i32
    %c0_i32_0 = arith.constant 0 : i32
    return %arg0, %c0_i32 : i32, i32
  }
  func.func @transform_13(%arg0: i32) -> (i32, i32) {
    %c0_i32 = arith.constant 0 : i32
    %c0_i32_0 = arith.constant 0 : i32
    return %arg0, %c0_i32 : i32, i32
  }
  func.func @transform_14(%arg0: i32) -> (i32, i32) {
    %c0_i32 = arith.constant 0 : i32
    %c0_i32_0 = arith.constant 0 : i32
    return %arg0, %c0_i32 : i32, i32
  }
  func.func @transform_15(%arg0: i32) -> (i32, i32) {
    %c0_i32 = arith.constant 0 : i32
    %c0_i32_0 = arith.constant 0 : i32
    return %arg0, %c0_i32 : i32, i32
  }
  func.func @transform_16(%arg0: i32) -> (i32, i32) {
    %c0_i32 = arith.constant 0 : i32
    %c0_i32_0 = arith.constant 0 : i32
    return %arg0, %c0_i32 : i32, i32
  }
  func.func @transform_17(%arg0: i32) -> (i32, i32) {
    %c0_i32 = arith.constant 0 : i32
    %c0_i32_0 = arith.constant 0 : i32
    return %arg0, %c0_i32 : i32, i32
  }
  func.func @transform_18(%arg0: i32) -> (i32, i32) {
    %c0_i32 = arith.constant 0 : i32
    %c0_i32_0 = arith.constant 0 : i32
    return %arg0, %c0_i32 : i32, i32
  }
}

</mosaic_0001>

<bundles_post_ra>
// kernel: tpu_custom_call.1
= control target key start
LH: loop header
LB: loop body
LE: loop exit
PB: predicated region body
PF: predicated region fallthrough
CT: control target
= control target key end

     0   :  { %s3071_s0 = inlined_call_operand.hbm [shape: f32[16,128], index: 0, kind: input, shape index: {}]   ;;  %s3072_s1 = inlined_call_operand.hbm [shape: f32[16,128], index: 1, kind: input, shape index: {}]   ;;  %s3073_s2 = inlined_call_operand.hbm [shape: f32[16,128], index: 2, kind: input, shape index: {}]   ;;  %s3074_s3 = inlined_call_operand.hbm [shape: f32[16,128], index: 3, kind: input, shape index: {}]   ;;  %s3075_s4 = inlined_call_operand.hbm [shape: f32[16,128], index: 4, kind: input, shape index: {}]   ;;  %s3076_s5 = inlined_call_operand.vmem [shape: f32[16,128], index: 5, kind: input, shape index: {}]   ;;  %s3077_s6 = inlined_call_operand.hbm [shape: f32[16,128], index: 6, kind: input, shape index: {}]   ;;  %s3078_s7 = inlined_call_operand.hbm [shape: f32[16,128], index: 7, kind: input, shape index: {}]   ;;  %s3079_s8 = inlined_call_operand.hbm [shape: f32[16,128], index: 8, kind: input, shape index: {}]   ;;  %s3080_s9 = inlined_call_operand.vmem [shape: f32[16,128], index: 9, kind: input, shape index: {}]   ;;  %s3081_s10 = inlined_call_operand.hbm [shape: f32[16,128], index: 10, kind: input, shape index: {}]   ;;  %s3082_s11 = inlined_call_operand.hbm [shape: f32[16,128], index: 11, kind: input, shape index: {}]   ;;  %s3083_s12 = inlined_call_operand.hbm [shape: f32[16,128], index: 12, kind: input, shape index: {}]   ;;  %s3084_s13 = inlined_call_operand.vmem [shape: f32[16,128], index: 13, kind: input, shape index: {}]   ;;  %s3085_s14 = inlined_call_operand.hbm [shape: f32[16,128], index: 14, kind: input, shape index: {}]   ;;  %s3086_s15 = inlined_call_operand.hbm [shape: f32[16,128], index: 15, kind: input, shape index: {}]   ;;  %s3087_s16 = inlined_call_operand.hbm [shape: f32[16,128], index: 16, kind: input, shape index: {}]   ;;  %s3088_s17 = inlined_call_operand.vmem [shape: f32[16,128], index: 17, kind: input, shape index: {}]   ;;  %s3089_s18 = inlined_call_operand.hbm [shape: f32[16,128], index: 18, kind: output, shape index: {}]  }
   0x1   :  { %3106 = sst [smem:[#allocation42_spill]] %s3071_s0 }
   0x2   :  { %3107 = sst [smem:[#allocation43_spill]] %s3072_s1 }
   0x3   :  { %3108 = sst [smem:[#allocation44_spill]] %s3073_s2 }
   0x4   :  { %3109 = sst [smem:[#allocation45_spill]] %s3074_s3 }
   0x5   :  { %3110 = sst [smem:[#allocation46_spill]] %s3076_s5 }
   0x6   :  { %3111 = sst [smem:[#allocation47_spill]] %s3077_s6 }
   0x7   :  { %3112 = sst [smem:[#allocation48_spill]] %s3080_s9 }
   0x8   :  { %3113 = sst [smem:[#allocation49_spill]] %s3084_s13 }
   0x9   :  { %3114 = sst [smem:[#allocation50_spill]] %s3088_s17 }
   0xa   :  { %3115 = sst [smem:[#allocation51_spill]] %s3089_s18 }
   0xb   :  { %23 = vsyncpa [#allocation3], 0 }
   0xc   :  { %25 = vsyncpa [#allocation3 + $0x1], 0 }
   0xd   :  { %26 = vsyncpa [#allocation6], 0 }
   0xe   :  { %28 = vsyncpa [#allocation6 + $0x1], 0 }
   0xf   :  { %29 = vsyncpa [#allocation9], 0 }
  0x10   :  { %31 = vsyncpa [#allocation9 + $0x1], 0 }
  0x11   :  { %32 = vsyncpa [#allocation12], 0 }
  0x12   :  { %34 = vsyncpa [#allocation12 + $0x1], 0 }
  0x13   :  { %35 = vsyncpa [#allocation15], 0 }
  0x14   :  { %37 = vsyncpa [#allocation15 + $0x1], 0 }
  0x15   :  { %38 = vsyncpa [#allocation18], 0 }
  0x16   :  { %40 = vsyncpa [#allocation18 + $0x1], 0 }
  0x17   :  { %41 = vsyncpa [#allocation21], 0 }
  0x18   :  { %43 = vsyncpa [#allocation21 + $0x1], 0 }
  0x19   :  { %44 = vsyncpa [#allocation24], 0 }
  0x1a   :  { %46 = vsyncpa [#allocation24 + $0x1], 0 }
  0x1b   :  { %47 = vsyncpa [#allocation4], 0 }
  0x1c   :  { %49 = vsyncpa [#allocation4 + $0x1], 0  ;;  %s2428_s27 = smov 0   ;;  %s2430_s28 = smov 0  }
  0x1d   :  { %s2432_s29 = smov 0   ;;  %s2434_s30 = smov 0  }
  0x1e LB: > { %3116 = sst [smem:[#allocation35_spill]] %s2304_s27  ;;  %s2449_s0 = sadd.s32 4294967295, %s2316_s30   ;;  %s2316_s30 = sphi %s2434_s30, %s3167_s30   ;;  %s2312_s29 = sphi %s2432_s29, %s3169_s29   ;;  %s2308_s28 = sphi %s2430_s28, %s3171_s28   ;;  %s2304_s27 = sphi %s2428_s27, %s3170_s27  }
  0x1f   : > { %3117 = sst [smem:[#allocation36_spill]] %s2312_s29  ;;  %s1684_s19 = sadd.s32 4294967294, %s2316_s30  }
  0x20   : > { %3118 = sst [smem:[#allocation37_spill]] %s2449_s0  ;;  %s2453_s1 = sadd.s32 1, %s2316_s30  }
  0x21   : > { %3119 = sst [smem:[#allocation38_spill]] %s2453_s1  ;;  %s62_s20 = sadd.s32 1, %s2312_s29 }
  0x22   : > { %s59_s21 = ssub.s32 %s2316_s30, %s2453_s1  ;;  %p69_p0 = scmp.ne.s32.totalorder %s2312_s29, %s2308_s28 }
  0x23   : > { %p60_p1 = scmp.eq.s32.totalorder %s59_s21, 0  ;;  %p70_p2 = scmp.eq.s32.totalorder %s2316_s30, 0 }
  0x24   : > { %p75_p3 = scmp.ne.s32.totalorder %s2308_s28, %s2304_s27  ;;  %p76_p4 = scmp.eq.s32.totalorder %s2449_s0, 0 }
  0x25   : > { %s2465_s22 = scalar_select %p60_p1, %s2312_s29, %s62_s20  }
  0x26   : > { %p2467_p5 = por %p70_p2, %p69_p0  ;;  %p2471_p6 = por %p76_p4, %p75_p3 }
  0x27   : > { %3120 = sst [smem:[#allocation39_spill]] %s2465_s22  ;;  %p541_p7 = scmp.eq.s32.totalorder %s2449_s0, 1 }
  0x28   : > { %s3122_s23 = scalar_select %p2471_p6, 1, 0 }
  0x29   : > { %p547_p8 = scmp.eq.s32.totalorder %s1684_s19, 1  ;;  %p2476_p9 = por %p541_p7, %p69_p0 }
  0x2a   : > { %p3101_p11 = scmp.ge.s32.totalorder %s2316_s30, 2 }
  0x2b   : > { %s3123_s24 = scalar_select %p2476_p9, 1, 0 }
  0x2c   : > { %p2480_p10 = por %p547_p8, %p75_p3  ;;  %563 = sbr.rel (%p3101_p11) target bundleno = 402 (0x192), region = 16 }
  0x2d   : > { %3124 = sst [smem:[#allocation40_spill]] %s3123_s24  ;;  %s2488_s26 = sand.u32 (!%p3101_p11), 1, %s2312_s29  }
  0x2e   : > { %s3125_s25 = scalar_select %p2480_p10, 1, 0 }
  0x2f   : > { %s2491_s19 = sshll.u32 (!%p3101_p11), %s2316_s30, 7  ;;  %s2494_s20 = sshll.u32 (!%p3101_p11), %s2488_s26, 3 }
  0x30   : > { %3126 = sst [smem:[#allocation41_spill]] %s3125_s25  ;;  %s2497_s21 = sand.u32 (!%p3101_p11), 1, %s2316_s30  }
  0x31   : > { %s3127_s25 = sld [smem:[#allocation43_spill]] (!%p3101_p11)  ;;  %s589_s29 = scalar_lea.vmem (!%p3101_p11), [#allocation5], %s2494_s20 }
  0x32   : > { %s596_s18 = sshll.u32 (!%p3101_p11), %s589_s29, 4  ;;  %s597_s18 = int_to_ptr.vmem [resolvable:$true] %s596_s18 }
  0x37   : > { %s2503_s27 = scalar_lea.hbm %s3127_s25, %s2491_s19  ;;  %s1834_s1 = scalar_lea.hbm %s3127_s25, 256 }
  0x38   : > { %s1830_s17 = scalar_lea.hbm %s2503_s27, 128  ;;  %p1835_p1 = scmp.lt.u32.totalorder %s2503_s27, %s3127_s25 }
  0x39   : > { %p1831_p12 = scmp.ne.s32.totalorder %s2503_s27, %s1830_s17  ;;  %p1836_p2 = scmp.lt.u32.totalorder %s1834_s1, %s1830_s17 }
  0x3a   : > { %p1838_p4 = scmp.lt.u32.totalorder %s1830_s17, %s2503_s27 }
  0x3b   : > { %p1832_p13 = pnand %p1831_p12, %p2467_p5  ;;  %p1837_p3 = por %p1836_p2, %p1835_p1 }
  0x3d   : > { %p1833_p0 = pneg %p1832_p13  ;;  %p1839_p7 = por %p1838_p4, %p1837_p3 }
  0x3f   : > { %p1840_p8 = pnand %p1839_p7, %p1833_p0 }
  0x41   : > { %1843 = shalt.err (!%p1840_p8)
}
  0x42   : > { %s1844_s29 = scalar_lea.vmem %s597_s18, 128  ;;  %s2318_s24 = smov [#allocation5]  }
  0x43   : > { %p1845_p11 = scmp.ne.s32.totalorder %s597_s18, %s1844_s29  ;;  %s1848_s0 = sshll.u32 %s2318_s24, 4  ;;  %s1849_s0 = int_to_ptr.vmem [resolvable:$false] %s1848_s0 }
  0x44   : > { %s1850_s9 = scalar_lea.vmem %s1849_s0, 256  ;;  %p1851_p10 = scmp.lt.s32.totalorder %s597_s18, %s1849_s0 }
  0x45   : > { %p1846_p12 = pnand %p1845_p11, %p2467_p5  ;;  %p1852_p9 = scmp.lt.s32.totalorder %s1850_s9, %s1844_s29 }
  0x47   : > { %p1847_p13 = pneg %p1846_p12  ;;  %p1853_p6 = por %p1852_p9, %p1851_p10 }
  0x49   : > { %p1854_p1 = pnand %p1853_p6, %p1847_p13 }
  0x4b   : > { %1857 = shalt.err (!%p1854_p1)
}
  0x4c   : > { %s3128_s5 = scalar_lea.sflag [#allocation6], %s2497_s21  ;;  %s3129_s3 = sld [smem:[#allocation45_spill]] }
  0x4d   : > { %1740 = dma.hbm_to_vmem [thread:$0]  (%p2467_p5), %s2503_s27, 128, %s597_s18, %s3128_s5  }
  0x4e   : > { %s625_s0 = scalar_lea.vmem [#allocation8], %s2494_s20 }
  0x4f   : > { %s632_s1 = sshll.u32 %s625_s0, 4  ;;  %s633_s1 = int_to_ptr.vmem [resolvable:$true] %s632_s1 }
  0x52   : > { %s2530_s24 = scalar_lea.hbm %s3129_s3, %s2491_s19  ;;  %s1862_s27 = scalar_lea.hbm %s3129_s3, 256 }
  0x53   : > { %s1858_s29 = scalar_lea.hbm %s2530_s24, 128  ;;  %p1863_p11 = scmp.lt.u32.totalorder %s2530_s24, %s3129_s3 }
  0x54   : > { %p1859_p6 = scmp.ne.s32.totalorder %s2530_s24, %s1858_s29  ;;  %p1864_p0 = scmp.lt.u32.totalorder %s1862_s27, %s1858_s29 }
  0x55   : > { %p1866_p3 = scmp.lt.u32.totalorder %s1858_s29, %s2530_s24 }
  0x56   : > { %p1860_p9 = pnand %p1859_p6, %p2467_p5  ;;  %p1865_p2 = por %p1864_p0, %p1863_p11 }
  0x58   : > { %p1861_p10 = pneg %p1860_p9  ;;  %p1867_p4 = por %p1866_p3, %p1865_p2 }
  0x5a   : > { %p1868_p7 = pnand %p1867_p4, %p1861_p10 }
  0x5c   : > { %1871 = shalt.err (!%p1868_p7)
}
  0x5d   : > { %s1872_s17 = scalar_lea.vmem %s633_s1, 128  ;;  %s2319_s0 = smov [#allocation8]  }
  0x5e   : > { %p1873_p8 = scmp.ne.s32.totalorder %s633_s1, %s1872_s17  ;;  %s1876_s22 = sshll.u32 %s2319_s0, 4  ;;  %s1877_s22 = int_to_ptr.vmem [resolvable:$false] %s1876_s22 }
  0x5f   : > { %s1878_s9 = scalar_lea.vmem %s1877_s22, 256  ;;  %p1879_p1 = scmp.lt.s32.totalorder %s633_s1, %s1877_s22 }
  0x60   : > { %p1874_p12 = pnand %p1873_p8, %p2467_p5  ;;  %p1880_p6 = scmp.lt.s32.totalorder %s1878_s9, %s1872_s17 }
  0x62   : > { %p1875_p13 = pneg %p1874_p12  ;;  %p1881_p9 = por %p1880_p6, %p1879_p1 }
  0x64   : > { %p1882_p0 = pnand %p1881_p9, %p1875_p13 }
  0x66   : > { %1885 = shalt.err (!%p1882_p0)
}
  0x67   : > { %s3130_s29 = scalar_lea.sflag [#allocation9], %s2497_s21  ;;  %s3131_s6 = sld [smem:[#allocation47_spill]] }
  0x68   : > { %1742 = dma.hbm_to_vmem [thread:$0]  (%p2467_p5), %s2530_s24, 128, %s633_s1, %s3130_s29  }
  0x69   : > { %s668_s22 = scalar_lea.vmem [#allocation11], %s2494_s20 }
  0x6a   : > { %s675_s13 = sshll.u32 %s668_s22, 4  ;;  %s676_s13 = int_to_ptr.vmem [resolvable:$true] %s675_s13 }
  0x6d   : > { %s2557_s5 = scalar_lea.hbm %s3131_s6, %s2491_s19  ;;  %s1890_s1 = scalar_lea.hbm %s3131_s6, 256 }
  0x6e   : > { %s1886_s0 = scalar_lea.hbm %s2557_s5, 128  ;;  %p1891_p3 = scmp.lt.u32.totalorder %s2557_s5, %s3131_s6 }
  0x6f   : > { %p1887_p10 = scmp.ne.s32.totalorder %s2557_s5, %s1886_s0  ;;  %p1892_p4 = scmp.lt.u32.totalorder %s1890_s1, %s1886_s0 }
  0x70   : > { %p1894_p8 = scmp.lt.u32.totalorder %s1886_s0, %s2557_s5 }
  0x71   : > { %p1888_p11 = pnand %p1887_p10, %p2467_p5  ;;  %p1893_p7 = por %p1892_p4, %p1891_p3 }
  0x73   : > { %p1889_p2 = pneg %p1888_p11  ;;  %p1895_p12 = por %p1894_p8, %p1893_p7 }
  0x75   : > { %p1896_p13 = pnand %p1895_p12, %p1889_p2 }
  0x77   : > { %1899 = shalt.err (!%p1896_p13)
}
  0x78   : > { %s1900_s27 = scalar_lea.vmem %s676_s13, 128  ;;  %s2320_s22 = smov [#allocation11]  }
  0x79   : > { %p1901_p1 = scmp.ne.s32.totalorder %s676_s13, %s1900_s27  ;;  %s1904_s17 = sshll.u32 %s2320_s22, 4  ;;  %s1905_s17 = int_to_ptr.vmem [resolvable:$false] %s1904_s17 }
  0x7a   : > { %s1906_s9 = scalar_lea.vmem %s1905_s17, 256  ;;  %p1907_p0 = scmp.lt.s32.totalorder %s676_s13, %s1905_s17 }
  0x7b   : > { %p1902_p6 = pnand %p1901_p1, %p2467_p5  ;;  %p1908_p10 = scmp.lt.s32.totalorder %s1906_s9, %s1900_s27 }
  0x7d   : > { %p1903_p9 = pneg %p1902_p6  ;;  %p1909_p11 = por %p1908_p10, %p1907_p0 }
  0x7f   : > { %p1910_p3 = pnand %p1909_p11, %p1903_p9 }
  0x81   : > { %1913 = shalt.err (!%p1910_p3)
}
  0x82   : > { %s3132_s0 = scalar_lea.sflag [#allocation12], %s2497_s21  ;;  %s2584_s29 = scalar_lea.hbm %s3079_s8, %s2491_s19 }
  0x83   : > { %1744 = dma.hbm_to_vmem [thread:$0]  (%p2467_p5), %s2557_s5, 128, %s676_s13, %s3132_s0  }
  0x84   : > { %s704_s17 = scalar_lea.vmem [#allocation14], %s2494_s20  ;;  %s1914_s22 = scalar_lea.hbm %s2584_s29, 128 }
  0x85   : > { %s711_s18 = sshll.u32 %s704_s17, 4  ;;  %p1915_p2 = scmp.ne.s32.totalorder %s2584_s29, %s1914_s22  ;;  %s712_s18 = int_to_ptr.vmem [resolvable:$true] %s711_s18 }
  0x86   : > { %s1918_s13 = scalar_lea.hbm %s3079_s8, 256  ;;  %p1919_p8 = scmp.lt.u32.totalorder %s2584_s29, %s3079_s8 }
  0x87   : > { %p1916_p4 = pnand %p1915_p2, %p2467_p5  ;;  %p1920_p12 = scmp.lt.u32.totalorder %s1918_s13, %s1914_s22 }
  0x88   : > { %p1922_p1 = scmp.lt.u32.totalorder %s1914_s22, %s2584_s29 }
  0x89   : > { %p1917_p7 = pneg %p1916_p4  ;;  %p1921_p13 = por %p1920_p12, %p1919_p8 }
  0x8b   : > { %p1923_p6 = por %p1922_p1, %p1921_p13 }
  0x8d   : > { %p1924_p9 = pnand %p1923_p6, %p1917_p7 }
  0x8f   : > { %1927 = shalt.err (!%p1924_p9)
}
  0x90   : > { %s1928_s1 = scalar_lea.vmem %s712_s18, 128  ;;  %s2321_s17 = smov [#allocation14]  }
  0x91   : > { %p1929_p0 = scmp.ne.s32.totalorder %s712_s18, %s1928_s1  ;;  %s1932_s27 = sshll.u32 %s2321_s17, 4  ;;  %s1933_s27 = int_to_ptr.vmem [resolvable:$false] %s1932_s27 }
  0x92   : > { %s1934_s9 = scalar_lea.vmem %s1933_s27, 256  ;;  %p1935_p3 = scmp.lt.s32.totalorder %s712_s18, %s1933_s27 }
  0x93   : > { %p1930_p10 = pnand %p1929_p0, %p2467_p5  ;;  %p1936_p2 = scmp.lt.s32.totalorder %s1934_s9, %s1928_s1 }
  0x95   : > { %p1931_p11 = pneg %p1930_p10  ;;  %p1937_p4 = por %p1936_p2, %p1935_p3 }
  0x97   : > { %p1938_p8 = pnand %p1937_p4, %p1931_p11 }
  0x99   : > { %1941 = shalt.err (!%p1938_p8)
}
  0x9a   : > { %s3133_s22 = scalar_lea.sflag [#allocation15], %s2497_s21  ;;  %s2611_s0 = scalar_lea.hbm %s3082_s11, %s2491_s19 }
  0x9b   : > { %1746 = dma.hbm_to_vmem [thread:$0]  (%p2467_p5), %s2584_s29, 128, %s712_s18, %s3133_s22  }
  0x9c   : > { %s747_s27 = scalar_lea.vmem [#allocation17], %s2494_s20  ;;  %s1942_s17 = scalar_lea.hbm %s2611_s0, 128 }
  0x9d   : > { %s754_s24 = sshll.u32 %s747_s27, 4  ;;  %p1943_p7 = scmp.ne.s32.totalorder %s2611_s0, %s1942_s17  ;;  %s755_s24 = int_to_ptr.vmem [resolvable:$true] %s754_s24 }
  0x9e   : > { %s1946_s18 = scalar_lea.hbm %s3082_s11, 256  ;;  %p1947_p1 = scmp.lt.u32.totalorder %s2611_s0, %s3082_s11 }
  0x9f   : > { %p1944_p12 = pnand %p1943_p7, %p2467_p5  ;;  %p1948_p6 = scmp.lt.u32.totalorder %s1946_s18, %s1942_s17 }
  0xa0   : > { %p1950_p0 = scmp.lt.u32.totalorder %s1942_s17, %s2611_s0 }
  0xa1   : > { %p1945_p13 = pneg %p1944_p12  ;;  %p1949_p9 = por %p1948_p6, %p1947_p1 }
  0xa3   : > { %p1951_p10 = por %p1950_p0, %p1949_p9 }
  0xa5   : > { %p1952_p11 = pnand %p1951_p10, %p1945_p13 }
  0xa7   : > { %1955 = shalt.err (!%p1952_p11)
}
  0xa8   : > { %s1956_s13 = scalar_lea.vmem %s755_s24, 128  ;;  %s2322_s27 = smov [#allocation17]  }
  0xa9   : > { %p1957_p3 = scmp.ne.s32.totalorder %s755_s24, %s1956_s13  ;;  %s1960_s1 = sshll.u32 %s2322_s27, 4  ;;  %s1961_s1 = int_to_ptr.vmem [resolvable:$false] %s1960_s1 }
  0xaa   : > { %s1962_s9 = scalar_lea.vmem %s1961_s1, 256  ;;  %p1963_p8 = scmp.lt.s32.totalorder %s755_s24, %s1961_s1 }
  0xab   : > { %p1958_p2 = pnand %p1957_p3, %p2467_p5  ;;  %p1964_p7 = scmp.lt.s32.totalorder %s1962_s9, %s1956_s13 }
  0xad   : > { %p1959_p4 = pneg %p1958_p2  ;;  %p1965_p12 = por %p1964_p7, %p1963_p8 }
  0xaf   : > { %p1966_p1 = pnand %p1965_p12, %p1959_p4 }
  0xb1   : > { %1969 = shalt.err (!%p1966_p1)
}
  0xb2   : > { %s3134_s17 = scalar_lea.sflag [#allocation18], %s2497_s21  ;;  %s2638_s22 = scalar_lea.hbm %s3085_s14, %s2491_s19 }
  0xb3   : > { %1748 = dma.hbm_to_vmem [thread:$0]  (%p2467_p5), %s2611_s0, 128, %s755_s24, %s3134_s17  }
  0xb4   : > { %s790_s1 = scalar_lea.vmem [#allocation20], %s2494_s20  ;;  %s1970_s27 = scalar_lea.hbm %s2638_s22, 128 }
  0xb5   : > { %s797_s5 = sshll.u32 %s790_s1, 4  ;;  %p1971_p13 = scmp.ne.s32.totalorder %s2638_s22, %s1970_s27  ;;  %s798_s5 = int_to_ptr.vmem [resolvable:$true] %s797_s5 }
  0xb6   : > { %s1974_s24 = scalar_lea.hbm %s3085_s14, 256  ;;  %p1975_p0 = scmp.lt.u32.totalorder %s2638_s22, %s3085_s14 }
  0xb7   : > { %p1972_p6 = pnand %p1971_p13, %p2467_p5  ;;  %p1976_p10 = scmp.lt.u32.totalorder %s1974_s24, %s1970_s27 }
  0xb8   : > { %p1978_p3 = scmp.lt.u32.totalorder %s1970_s27, %s2638_s22 }
  0xb9   : > { %p1973_p9 = pneg %p1972_p6  ;;  %p1977_p11 = por %p1976_p10, %p1975_p0 }
  0xbb   : > { %p1979_p2 = por %p1978_p3, %p1977_p11 }
  0xbd   : > { %p1980_p4 = pnand %p1979_p2, %p1973_p9 }
  0xbf   : > { %1983 = shalt.err (!%p1980_p4)
}
  0xc0   : > { %s1984_s18 = scalar_lea.vmem %s798_s5, 128  ;;  %s2323_s1 = smov [#allocation20]  }
  0xc1   : > { %p1985_p8 = scmp.ne.s32.totalorder %s798_s5, %s1984_s18  ;;  %s1988_s13 = sshll.u32 %s2323_s1, 4  ;;  %s1989_s13 = int_to_ptr.vmem [resolvable:$false] %s1988_s13 }
  0xc2   : > { %s1990_s9 = scalar_lea.vmem %s1989_s13, 256  ;;  %p1991_p1 = scmp.lt.s32.totalorder %s798_s5, %s1989_s13 }
  0xc3   : > { %p1986_p7 = pnand %p1985_p8, %p2467_p5  ;;  %p1992_p13 = scmp.lt.s32.totalorder %s1990_s9, %s1984_s18 }
  0xc5   : > { %p1987_p12 = pneg %p1986_p7  ;;  %p1993_p6 = por %p1992_p13, %p1991_p1 }
  0xc7   : > { %p1994_p0 = pnand %p1993_p6, %p1987_p12 }
  0xc9   : > { %1997 = shalt.err (!%p1994_p0)
}
  0xca   : > { %s3135_s27 = scalar_lea.sflag [#allocation21], %s2497_s21  ;;  %s3136_s17 = sld [smem:[#allocation42_spill]] }
  0xcb   : > { %1750 = dma.hbm_to_vmem [thread:$0]  (%p2467_p5), %s2638_s22, 128, %s798_s5, %s3135_s27  }
  0xcc   : > { %s571_s13 = scalar_lea.vmem [#allocation2], %s2494_s20  ;;  %s568_s1 = scalar_lea.sflag [#allocation3], %s2488_s26 }
  0xcd   : > { %s578_s18 = sshll.u32 %s571_s13, 4  ;;  %s579_s18 = int_to_ptr.vmem [resolvable:$true] %s578_s18 }
  0xd0   : > { %s2665_s29 = scalar_lea.hbm %s3136_s17, %s2491_s19  ;;  %s2002_s5 = scalar_lea.hbm %s3136_s17, 256 }
  0xd1   : > { %s1998_s9 = scalar_lea.hbm %s2665_s29, 128  ;;  %p2003_p3 = scmp.lt.u32.totalorder %s2665_s29, %s3136_s17 }
  0xd2   : > { %p1999_p9 = scmp.ne.s32.totalorder %s2665_s29, %s1998_s9  ;;  %p2004_p2 = scmp.lt.u32.totalorder %s2002_s5, %s1998_s9 }
  0xd3   : > { %p2006_p8 = scmp.lt.u32.totalorder %s1998_s9, %s2665_s29 }
  0xd4   : > { %p2000_p10 = pnand %p1999_p9, %p2467_p5  ;;  %p2005_p4 = por %p2004_p2, %p2003_p3 }
  0xd6   : > { %p2001_p11 = pneg %p2000_p10  ;;  %p2007_p7 = por %p2006_p8, %p2005_p4 }
  0xd8   : > { %p2008_p12 = pnand %p2007_p7, %p2001_p11 }
  0xda   : > { %2011 = shalt.err (!%p2008_p12)
}
  0xdb   : > { %s2012_s24 = scalar_lea.vmem %s579_s18, 128  ;;  %s2324_s13 = smov [#allocation2]  }
  0xdc   : > { %p2013_p1 = scmp.ne.s32.totalorder %s579_s18, %s2012_s24  ;;  %s2016_s6 = sshll.u32 %s2324_s13, 4  ;;  %s2017_s6 = int_to_ptr.vmem [resolvable:$false] %s2016_s6 }
  0xdd   : > { %s2018_s3 = scalar_lea.vmem %s2017_s6, 256  ;;  %p2019_p0 = scmp.lt.s32.totalorder %s579_s18, %s2017_s6 }
  0xde   : > { %p2014_p13 = pnand %p2013_p1, %p2467_p5  ;;  %p2020_p9 = scmp.lt.s32.totalorder %s2018_s3, %s2012_s24 }
  0xe0   : > { %p2015_p6 = pneg %p2014_p13  ;;  %p2021_p10 = por %p2020_p9, %p2019_p0 }
  0xe2   : > { %p2022_p2 = pnand %p2021_p10, %p2015_p6 }
  0xe4   : > { %2025 = shalt.err (!%p2022_p2)
}
  0xe5   : > { %1739 = dma.hbm_to_vmem [thread:$0]  (%p2467_p5), %s2665_s29, 128, %s579_s18, %s568_s1  }
  0xe6   : > { %s3137_s5 = sld [smem:[#allocation44_spill]]  ;;  %s607_s6 = scalar_lea.vmem [#allocation7], %s2494_s20 }
  0xe7   : > { %s614_s0 = sshll.u32 %s607_s6, 4  ;;  %s615_s0 = int_to_ptr.vmem [resolvable:$true] %s614_s0 }
  0xec   : > { %s2690_s27 = scalar_lea.hbm %s3137_s5, %s2491_s19  ;;  %s2030_s29 = scalar_lea.hbm %s3137_s5, 256 }
  0xed   : > { %s2026_s24 = scalar_lea.hbm %s2690_s27, 128  ;;  %p2031_p8 = scmp.lt.u32.totalorder %s2690_s27, %s3137_s5 }
  0xee   : > { %p2027_p11 = scmp.ne.s32.totalorder %s2690_s27, %s2026_s24  ;;  %p2032_p7 = scmp.lt.u32.totalorder %s2030_s29, %s2026_s24 }
  0xef   : > { %p2034_p1 = scmp.lt.u32.totalorder %s2026_s24, %s2690_s27 }
  0xf0   : > { %p2028_p3 = pnand %p2027_p11, %p2467_p5  ;;  %p2033_p12 = por %p2032_p7, %p2031_p8 }
  0xf2   : > { %p2029_p4 = pneg %p2028_p3  ;;  %p2035_p13 = por %p2034_p1, %p2033_p12 }
  0xf4   : > { %p2036_p6 = pnand %p2035_p13, %p2029_p4 }
  0xf6   : > { %2039 = shalt.err (!%p2036_p6)
}
  0xf7   : > { %s2040_s9 = scalar_lea.vmem %s615_s0, 128  ;;  %s2325_s22 = smov [#allocation7]  }
  0xf8   : > { %p2041_p0 = scmp.ne.s32.totalorder %s615_s0, %s2040_s9  ;;  %s2044_s6 = sshll.u32 %s2325_s22, 4  ;;  %s2045_s6 = int_to_ptr.vmem [resolvable:$false] %s2044_s6 }
  0xf9   : > { %s2046_s13 = scalar_lea.vmem %s2045_s6, 256  ;;  %p2047_p2 = scmp.lt.s32.totalorder %s615_s0, %s2045_s6 }
  0xfa   : > { %p2042_p9 = pnand %p2041_p0, %p2467_p5  ;;  %p2048_p11 = scmp.lt.s32.totalorder %s2046_s13, %s2040_s9 }
  0xfc   : > { %p2043_p10 = pneg %p2042_p9  ;;  %p2049_p3 = por %p2048_p11, %p2047_p2 }
  0xfe   : > { %p2050_p7 = pnand %p2049_p3, %p2043_p10 }
 0x100   : > { %2053 = shalt.err (!%p2050_p7)
}
 0x101   : > { %s3138_s24 = scalar_lea.sflag [#allocation6], %s2497_s21  ;;  %s2716_s18 = scalar_lea.hbm %s3075_s4, %s2491_s19 }
 0x102   : > { %1741 = dma.hbm_to_vmem [thread:$0]  (%p2467_p5), %s2690_s27, 128, %s615_s0, %s3138_s24  }
 0x103   : > { %s643_s1 = scalar_lea.vmem [#allocation10], %s2494_s20  ;;  %s2054_s22 = scalar_lea.hbm %s2716_s18, 128 }
 0x104   : > { %s650_s9 = sshll.u32 %s643_s1, 4  ;;  %p2055_p4 = scmp.ne.s32.totalorder %s2716_s18, %s2054_s22  ;;  %s651_s9 = int_to_ptr.vmem [resolvable:$true] %s650_s9 }
 0x105   : > { %s2058_s27 = scalar_lea.hbm %s3075_s4, 256  ;;  %p2059_p1 = scmp.lt.u32.totalorder %s2716_s18, %s3075_s4 }
 0x106   : > { %p2056_p8 = pnand %p2055_p4, %p2467_p5  ;;  %p2060_p13 = scmp.lt.u32.totalorder %s2058_s27, %s2054_s22 }
 0x107   : > { %p2062_p0 = scmp.lt.u32.totalorder %s2054_s22, %s2716_s18 }
 0x108   : > { %p2057_p12 = pneg %p2056_p8  ;;  %p2061_p6 = por %p2060_p13, %p2059_p1 }
 0x10a   : > { %p2063_p9 = por %p2062_p0, %p2061_p6 }
 0x10c   : > { %p2064_p10 = pnand %p2063_p9, %p2057_p12 }
 0x10e   : > { %2067 = shalt.err (!%p2064_p10)
}
 0x10f   : > { %s2068_s3 = scalar_lea.vmem %s651_s9, 128  ;;  %s2326_s29 = smov [#allocation10]  }
 0x110   : > { %p2069_p2 = scmp.ne.s32.totalorder %s651_s9, %s2068_s3  ;;  %s2072_s1 = sshll.u32 %s2326_s29, 4  ;;  %s2073_s1 = int_to_ptr.vmem [resolvable:$false] %s2072_s1 }
 0x111   : > { %s2074_s6 = scalar_lea.vmem %s2073_s1, 256  ;;  %p2075_p7 = scmp.lt.s32.totalorder %s651_s9, %s2073_s1 }
 0x112   : > { %p2070_p11 = pnand %p2069_p2, %p2467_p5  ;;  %p2076_p4 = scmp.lt.s32.totalorder %s2074_s6, %s2068_s3 }
 0x114   : > { %p2071_p3 = pneg %p2070_p11  ;;  %p2077_p8 = por %p2076_p4, %p2075_p7 }
 0x116   : > { %p2078_p1 = pnand %p2077_p8, %p2071_p3 }
 0x118   : > { %2081 = shalt.err (!%p2078_p1)
}
 0x119   : > { %s3139_s22 = scalar_lea.sflag [#allocation9], %s2497_s21  ;;  %s2742_s0 = scalar_lea.hbm %s3078_s7, %s2491_s19 }
 0x11a   : > { %1743 = dma.hbm_to_vmem [thread:$0]  (%p2467_p5), %s2716_s18, 128, %s651_s9, %s3139_s22  }
 0x11b   : > { %s686_s24 = scalar_lea.vmem [#allocation13], %s2494_s20  ;;  %s2082_s29 = scalar_lea.hbm %s2742_s0, 128 }
 0x11c   : > { %s693_s3 = sshll.u32 %s686_s24, 4  ;;  %p2083_p12 = scmp.ne.s32.totalorder %s2742_s0, %s2082_s29  ;;  %s694_s3 = int_to_ptr.vmem [resolvable:$true] %s693_s3 }
 0x11d   : > { %s2086_s18 = scalar_lea.hbm %s3078_s7, 256  ;;  %p2087_p0 = scmp.lt.u32.totalorder %s2742_s0, %s3078_s7 }
 0x11e   : > { %p2084_p13 = pnand %p2083_p12, %p2467_p5  ;;  %p2088_p9 = scmp.lt.u32.totalorder %s2086_s18, %s2082_s29 }
 0x11f   : > { %p2090_p2 = scmp.lt.u32.totalorder %s2082_s29, %s2742_s0 }
 0x120   : > { %p2085_p6 = pneg %p2084_p13  ;;  %p2089_p10 = por %p2088_p9, %p2087_p0 }
 0x122   : > { %p2091_p11 = por %p2090_p2, %p2089_p10 }
 0x124   : > { %p2092_p3 = pnand %p2091_p11, %p2085_p6 }
 0x126   : > { %2095 = shalt.err (!%p2092_p3)
}
 0x127   : > { %s2096_s13 = scalar_lea.vmem %s694_s3, 128  ;;  %s2327_s27 = smov [#allocation13]  }
 0x128   : > { %p2097_p7 = scmp.ne.s32.totalorder %s694_s3, %s2096_s13  ;;  %s2100_s24 = sshll.u32 %s2327_s27, 4  ;;  %s2101_s24 = int_to_ptr.vmem [resolvable:$false] %s2100_s24 }
 0x129   : > { %s2102_s1 = scalar_lea.vmem %s2101_s24, 256  ;;  %p2103_p1 = scmp.lt.s32.totalorder %s694_s3, %s2101_s24 }
 0x12a   : > { %p2098_p4 = pnand %p2097_p7, %p2467_p5  ;;  %p2104_p12 = scmp.lt.s32.totalorder %s2102_s1, %s2096_s13 }
 0x12c   : > { %p2099_p8 = pneg %p2098_p4  ;;  %p2105_p13 = por %p2104_p12, %p2103_p1 }
 0x12e   : > { %p2106_p0 = pnand %p2105_p13, %p2099_p8 }
 0x130   : > { %2109 = shalt.err (!%p2106_p0)
}
 0x131   : > { %s3140_s29 = scalar_lea.sflag [#allocation12], %s2497_s21  ;;  %s2768_s9 = scalar_lea.hbm %s3081_s10, %s2491_s19 }
 0x132   : > { %1745 = dma.hbm_to_vmem [thread:$0]  (%p2467_p5), %s2742_s0, 128, %s694_s3, %s3140_s29  }
 0x133   : > { %s729_s22 = scalar_lea.vmem [#allocation16], %s2494_s20  ;;  %s2110_s27 = scalar_lea.hbm %s2768_s9, 128 }
 0x134   : > { %s736_s13 = sshll.u32 %s729_s22, 4  ;;  %p2111_p6 = scmp.ne.s32.totalorder %s2768_s9, %s2110_s27  ;;  %s737_s13 = int_to_ptr.vmem [resolvable:$true] %s736_s13 }
 0x135   : > { %s2114_s0 = scalar_lea.hbm %s3081_s10, 256  ;;  %p2115_p2 = scmp.lt.u32.totalorder %s2768_s9, %s3081_s10 }
 0x136   : > { %p2112_p9 = pnand %p2111_p6, %p2467_p5  ;;  %p2116_p11 = scmp.lt.u32.totalorder %s2114_s0, %s2110_s27 }
 0x137   : > { %p2118_p7 = scmp.lt.u32.totalorder %s2110_s27, %s2768_s9 }
 0x138   : > { %p2113_p10 = pneg %p2112_p9  ;;  %p2117_p3 = por %p2116_p11, %p2115_p2 }
 0x13a   : > { %p2119_p4 = por %p2118_p7, %p2117_p3 }
 0x13c   : > { %p2120_p8 = pnand %p2119_p4, %p2113_p10 }
 0x13e   : > { %2123 = shalt.err (!%p2120_p8)
}
 0x13f   : > { %s2124_s6 = scalar_lea.vmem %s737_s13, 128  ;;  %s2328_s18 = smov [#allocation16]  }
 0x140   : > { %p2125_p1 = scmp.ne.s32.totalorder %s737_s13, %s2124_s6  ;;  %s2128_s22 = sshll.u32 %s2328_s18, 4  ;;  %s2129_s22 = int_to_ptr.vmem [resolvable:$false] %s2128_s22 }
 0x141   : > { %s2130_s24 = scalar_lea.vmem %s2129_s22, 256  ;;  %p2131_p0 = scmp.lt.s32.totalorder %s737_s13, %s2129_s22 }
 0x142   : > { %p2126_p12 = pnand %p2125_p1, %p2467_p5  ;;  %p2132_p6 = scmp.lt.s32.totalorder %s2130_s24, %s2124_s6 }
 0x144   : > { %p2127_p13 = pneg %p2126_p12  ;;  %p2133_p9 = por %p2132_p6, %p2131_p0 }
 0x146   : > { %p2134_p2 = pnand %p2133_p9, %p2127_p13 }
 0x148   : > { %2137 = shalt.err (!%p2134_p2)
}
 0x149   : > { %s3141_s27 = scalar_lea.sflag [#allocation15], %s2497_s21  ;;  %s2794_s3 = scalar_lea.hbm %s3083_s12, %s2491_s19 }
 0x14a   : > { %1747 = dma.hbm_to_vmem [thread:$0]  (%p2467_p5), %s2768_s9, 128, %s737_s13, %s3141_s27  }
 0x14b   : > { %s765_s29 = scalar_lea.vmem [#allocation19], %s2494_s20  ;;  %s2138_s18 = scalar_lea.hbm %s2794_s3, 128 }
 0x14c   : > { %s772_s6 = sshll.u32 %s765_s29, 4  ;;  %p2139_p10 = scmp.ne.s32.totalorder %s2794_s3, %s2138_s18  ;;  %s773_s6 = int_to_ptr.vmem [resolvable:$true] %s772_s6 }
 0x14d   : > { %s2142_s9 = scalar_lea.hbm %s3083_s12, 256  ;;  %p2143_p7 = scmp.lt.u32.totalorder %s2794_s3, %s3083_s12 }
 0x14e   : > { %p2140_p11 = pnand %p2139_p10, %p2467_p5  ;;  %p2144_p4 = scmp.lt.u32.totalorder %s2142_s9, %s2138_s18 }
 0x14f   : > { %p2146_p1 = scmp.lt.u32.totalorder %s2138_s18, %s2794_s3 }
 0x150   : > { %p2141_p3 = pneg %p2140_p11  ;;  %p2145_p8 = por %p2144_p4, %p2143_p7 }
 0x152   : > { %p2147_p12 = por %p2146_p1, %p2145_p8 }
 0x154   : > { %p2148_p13 = pnand %p2147_p12, %p2141_p3 }
 0x156   : > { %2151 = shalt.err (!%p2148_p13)
}
 0x157   : > { %s2152_s1 = scalar_lea.vmem %s773_s6, 128  ;;  %s2329_s0 = smov [#allocation19]  }
 0x158   : > { %p2153_p0 = scmp.ne.s32.totalorder %s773_s6, %s2152_s1  ;;  %s2156_s29 = sshll.u32 %s2329_s0, 4  ;;  %s2157_s29 = int_to_ptr.vmem [resolvable:$false] %s2156_s29 }
 0x159   : > { %s2158_s22 = scalar_lea.vmem %s2157_s29, 256  ;;  %p2159_p2 = scmp.lt.s32.totalorder %s773_s6, %s2157_s29 }
 0x15a   : > { %p2154_p6 = pnand %p2153_p0, %p2467_p5  ;;  %p2160_p10 = scmp.lt.s32.totalorder %s2158_s22, %s2152_s1 }
 0x15c   : > { %p2155_p9 = pneg %p2154_p6  ;;  %p2161_p11 = por %p2160_p10, %p2159_p2 }
 0x15e   : > { %p2162_p4 = pnand %p2161_p11, %p2155_p9 }
 0x160   : > { %2165 = shalt.err (!%p2162_p4)
}
 0x161   : > { %s3142_s18 = scalar_lea.sflag [#allocation18], %s2497_s21  ;;  %s2820_s13 = scalar_lea.hbm %s3086_s15, %s2491_s19 }
 0x162   : > { %1749 = dma.hbm_to_vmem [thread:$0]  (%p2467_p5), %s2794_s3, 128, %s773_s6, %s3142_s18  }
 0x163   : > { %s808_s27 = scalar_lea.vmem [#allocation22], %s2494_s20  ;;  %s2166_s0 = scalar_lea.hbm %s2820_s13, 128 }
 0x164   : > { %s815_s1 = sshll.u32 %s808_s27, 4  ;;  %p2167_p3 = scmp.ne.s32.totalorder %s2820_s13, %s2166_s0  ;;  %s816_s1 = int_to_ptr.vmem [resolvable:$true] %s815_s1 }
 0x165   : > { %s2170_s3 = scalar_lea.hbm %s3086_s15, 256  ;;  %p2171_p1 = scmp.lt.u32.totalorder %s2820_s13, %s3086_s15 }
 0x166   : > { %p2168_p7 = pnand %p2167_p3, %p2467_p5  ;;  %p2172_p12 = scmp.lt.u32.totalorder %s2170_s3, %s2166_s0 }
 0x167   : > { %p2174_p0 = scmp.lt.u32.totalorder %s2166_s0, %s2820_s13 }
 0x168   : > { %p2169_p8 = pneg %p2168_p7  ;;  %p2173_p13 = por %p2172_p12, %p2171_p1 }
 0x16a   : > { %p2175_p6 = por %p2174_p0, %p2173_p13 }
 0x16c   : > { %p2176_p9 = pnand %p2175_p6, %p2169_p8 }
 0x16e   : > { %2179 = shalt.err (!%p2176_p9)
}
 0x16f   : > { %s2180_s24 = scalar_lea.vmem %s816_s1, 128  ;;  %s2330_s9 = smov [#allocation22]  }
 0x170   : > { %p2181_p2 = scmp.ne.s32.totalorder %s816_s1, %s2180_s24  ;;  %s2184_s27 = sshll.u32 %s2330_s9, 4  ;;  %s2185_s27 = int_to_ptr.vmem [resolvable:$false] %s2184_s27 }
 0x171   : > { %s2186_s29 = scalar_lea.vmem %s2185_s27, 256  ;;  %p2187_p4 = scmp.lt.s32.totalorder %s816_s1, %s2185_s27 }
 0x172   : > { %p2182_p10 = pnand %p2181_p2, %p2467_p5  ;;  %p2188_p3 = scmp.lt.s32.totalorder %s2186_s29, %s2180_s24 }
 0x174   : > { %p2183_p11 = pneg %p2182_p10  ;;  %p2189_p7 = por %p2188_p3, %p2187_p4 }
 0x176   : > { %p2190_p1 = pnand %p2189_p7, %p2183_p11 }
 0x178   : > { %2193 = shalt.err (!%p2190_p1)
}
 0x179   : > { %s3143_s0 = scalar_lea.sflag [#allocation21], %s2497_s21  ;;  %s2846_s6 = scalar_lea.hbm %s3087_s16, %s2491_s19 }
 0x17a   : > { %1751 = dma.hbm_to_vmem [thread:$0]  (%p2467_p5), %s2820_s13, 128, %s816_s1, %s3143_s0  }
 0x17b   : > { %s826_s18 = scalar_lea.vmem [#allocation23], %s2494_s20  ;;  %s823_s9 = scalar_lea.sflag [#allocation24], %s2488_s26 }
 0x17c   : > { %s833_s24 = sshll.u32 %s826_s18, 4  ;;  %s2194_s21 = scalar_lea.hbm %s2846_s6, 128  ;;  %s834_s24 = int_to_ptr.vmem [resolvable:$true] %s833_s24 }
 0x17d   : > { %p2195_p8 = scmp.ne.s32.totalorder %s2846_s6, %s2194_s21  ;;  %s2198_s1 = scalar_lea.hbm %s3087_s16, 256 }
 0x17e   : > { %p2199_p0 = scmp.lt.u32.totalorder %s2846_s6, %s3087_s16  ;;  %p2200_p6 = scmp.lt.u32.totalorder %s2198_s1, %s2194_s21 }
 0x17f   : > { %p2196_p12 = pnand %p2195_p8, %p2467_p5  ;;  %p2202_p2 = scmp.lt.u32.totalorder %s2194_s21, %s2846_s6 }
 0x180   : > { %p2201_p9 = por %p2200_p6, %p2199_p0 }
 0x181   : > { %p2197_p13 = pneg %p2196_p12 }
 0x182   : > { %p2203_p10 = por %p2202_p2, %p2201_p9 }
 0x184   : > { %p2204_p11 = pnand %p2203_p10, %p2197_p13 }
 0x186   : > { %2207 = shalt.err (!%p2204_p11)
}
 0x187   : > { %s2208_s26 = scalar_lea.vmem %s834_s24, 128  ;;  %s2331_s20 = smov [#allocation23]  }
 0x188   : > { %p2209_p4 = scmp.ne.s32.totalorder %s834_s24, %s2208_s26  ;;  %s2212_s0 = sshll.u32 %s2331_s20, 4  ;;  %s2213_s0 = int_to_ptr.vmem [resolvable:$false] %s2212_s0 }
 0x189   : > { %s2214_s22 = scalar_lea.vmem %s2213_s0, 256  ;;  %p2215_p1 = scmp.lt.s32.totalorder %s834_s24, %s2213_s0 }
 0x18a   : > { %p2210_p3 = pnand %p2209_p4, %p2467_p5  ;;  %p2216_p8 = scmp.lt.s32.totalorder %s2214_s22, %s2208_s26 }
 0x18c   : > { %p2211_p7 = pneg %p2210_p3  ;;  %p2217_p12 = por %p2216_p8, %p2215_p1 }
 0x18e   : > { %p2218_p0 = pnand %p2217_p12, %p2211_p7 }
 0x190   : > { %2221 = shalt.err (!%p2218_p0)
}
 0x191   : > { %1752 = dma.hbm_to_vmem [thread:$0]  (%p2467_p5), %s2846_s6, 128, %s834_s24, %s823_s9  }
 0x192 PF: > { %p1715_p13 = scmp.ge.s32.totalorder %s2316_s30, 1  ;;  %p845_p6 = scmp.lt.s32.totalorder %s2316_s30, 3 }
 0x194   : > { %p846_p9 = pnand %p1715_p13, %p845_p6 }
 0x195   : > { %s2870_s3 = sand.u32 (!%p846_p9), 1, %s2308_s28   ;;  %p3144_p2 = scmp.ne.s32.totalorder (!%p846_p9), %s3122_s23, 0 }
 0x196   : > { %849 = sbr.rel (%p846_p9) target bundleno = 624 (0x270), region = 92  ;;  %s2873_s18 = sshll.u32 (!%p846_p9), %s2870_s3, 3 }
 0x197   : > { %s852_s21 = scalar_lea.sflag (!%p846_p9), [#allocation3], %s2870_s3  ;;  %s855_s2 = scalar_lea.vmem (!%p846_p9), [#allocation2], %s2873_s18 }
 0x19d   : > { %2267 = dma.done.wait (%p3144_p2), %s852_s21, 128  }
 0x19e   : > { %2269 = vsyncadd (%p3144_p2), %s852_s21, 4294967168  ;;  %s3145_s6 = sld [smem:[#allocation37_spill]] }
 0x1a4   : > { %s2882_s24 = sand.u32 1, %s3145_s6  }
 0x1a5   : > { %s861_s9 = scalar_lea.sflag [#allocation6], %s2882_s24 }
 0x1a6   : > { %2271 = dma.done.wait (%p3144_p2), %s861_s9, 256  }
 0x1a7   : > { %2273 = vsyncadd (%p3144_p2), %s861_s9, 4294967040  ;;  %s879_s1 = scalar_lea.sflag [#allocation9], %s2882_s24 }
 0x1a8   : > { %2275 = dma.done.wait (%p3144_p2), %s879_s1, 256  }
 0x1a9   : > { %2277 = vsyncadd (%p3144_p2), %s879_s1, 4294967040  ;;  %s891_s19 = scalar_lea.vmem [#allocation10], %s2873_s18  ;;  %s897_s26 = scalar_lea.sflag [#allocation12], %s2882_s24 }
 0x1aa   : > { %s900_s20 = scalar_lea.vmem [#allocation11], %s2873_s18 }
 0x1ab   : > { %2279 = dma.done.wait (%p3144_p2), %s897_s26, 256  }
 0x1ac   : > { %2281 = vsyncadd (%p3144_p2), %s897_s26, 4294967040  ;;  %s915_s22 = scalar_lea.sflag [#allocation15], %s2882_s24 }
 0x1ad   : > { %2283 = dma.done.wait (%p3144_p2), %s915_s22, 256  }
 0x1ae   : > { %2285 = vsyncadd (%p3144_p2), %s915_s22, 4294967040  ;;  %s933_s1 = scalar_lea.sflag [#allocation18], %s2882_s24 }
 0x1af   : > { %2287 = dma.done.wait (%p3144_p2), %s933_s1, 256  }
 0x1b0   : > { %2289 = vsyncadd (%p3144_p2), %s933_s1, 4294967040  ;;  %s945_s26 = scalar_lea.vmem [#allocation19], %s2873_s18  ;;  %s951_s21 = scalar_lea.sflag [#allocation21], %s2882_s24 }
 0x1b1   : > { %2291 = dma.done.wait (%p3144_p2), %s951_s21, 256  }
 0x1b2   : > { %2293 = vsyncadd (%p3144_p2), %s951_s21, 4294967040  ;;  %s963_s22 = scalar_lea.vmem [#allocation22], %s2873_s18  ;;  %s969_s29 = scalar_lea.sflag [#allocation24], %s2870_s3 }
 0x1b3   : > { %s972_s9 = scalar_lea.vmem [#allocation23], %s2873_s18 }
 0x1b4   : > { %2295 = dma.done.wait (%p3144_p2), %s969_s29, 128  }
 0x1b5   : > { %2297 = vsyncadd (%p3144_p2), %s969_s29, 4294967168  ;;  %p1106_p5 = scmp.lt.s32.totalorder %s3145_s6, 1  ;;  %s3146_s13 = sld [smem:[#allocation46_spill]]  ;;  %v2942_v1 = vld [vmem:[%s855_s2] sm:$0xff]  ;;  %v1128_v2 = vld [vmem:[%s900_s20] sm:$0xff] }
 0x1b6   : > { %v1155_v3 = vmul.f32 4.0, %v2942_v1  ;;  %v1156_v4 = vmul.f32 8.0, %v1128_v2  ;;  %v1134_v6 = vld [vmem:[%s945_s26] sm:$0xff]  ;;  %v1141_v10 = vsub.f32 %v2942_v1, %v1128_v2  ;;  %s3148_s29 = scalar_lea.vmem [#allocation5], %s2873_s18  ;;  %s3149_s20 = scalar_lea.vmem [#allocation7], %s2873_s18  ;;  %v1164_v41 = vmax.f32 %v2942_v1, 0.0 }
 0x1b7   : > { %s1107_s24 = scalar_select %p1106_p5, %s3145_s6, 1  ;;  %v1126_v9 = vld [vmem:[%s891_s19] sm:$0xff]  ;;  %v2955_v18 = vld [vmem:[%s3148_s29] sm:$0xff] }
 0x1b8   : > { %v1157_v5 = vadd.f32 %v1156_v4, %v1155_v3  ;;  %v1142_v13 = vmax.f32 %v1141_v10, 0.0  ;;  %v1137_v14 = vld [vmem:[%s963_s22] sm:$0xff]  ;;  %v1161_v23 = vmul.f32 0.23, %v2955_v18  ;;  %s3150_s26 = sld [smem:[#allocation49_spill]]  ;;  %s3152_s2 = sld [smem:[#allocation50_spill]] }
 0x1b9   : > { %s2934_s1 = sshll.u32 %s1107_s24, 3  ;;  %v2959_v19 = vld [vmem:[%s3149_s20] sm:$0xff]  ;;  %s3151_s24 = scalar_lea.vmem [#allocation16], %s2873_s18  ;;  %vm1209_vm5 = vcmp.le.f32.partialorder %v2955_v18, 0.0 }
 0x1ba   : > { %v1154_v16 = vmul.f32 %v1142_v13, %v1137_v14  ;;  %v2962_v21 = vsub.f32 1.0, %v2959_v19  ;;  %v1132_v43 = vld [vmem:[%s3151_s24] sm:$0xff]  ;;  %s3155_s29 = scalar_lea.vmem [#allocation17], %s2873_s18  ;;  %s3156_s20 = scalar_lea.vmem [#allocation14], %s2873_s18  ;;  %v1138_v14 = vld [vmem:[%s972_s9] sm:$0xff] }
 0x1bb   : > { %s1109_s27 = scalar_lea.vmem %s3146_s13, %s2934_s1  ;;  %v1165_v47 = vmul.f32 %v1164_v41, %v1132_v43  ;;  %vm1207_vm4 = vcmp.gt.f32.partialorder %v1138_v14, 0.0  ;;  %s3157_s9 = scalar_lea.vmem [#allocation8], %s2873_s18 }
 0x1bc   : > { %v1127_v0 = vld [vmem:[%s1109_s27] sm:$0xff]  ;;  %s3147_s27 = sld [smem:[#allocation48_spill]]  ;;  %v1162_v26 = vmul.f32 %v1161_v23, %v2962_v21  ;;  %s3160_s19 = sld [smem:[#allocation40_spill]] }
 0x1bd   : > { %1806 = vrcp.f32 %v1127_v0  ;;  %s1105_s0 = scalar_lea.vmem [#allocation25], %s2873_s18  ;;  %s3161_s23 = sld [smem:[#allocation51_spill]] }
 0x1be   : > { %1808 = vrcp.f32 %v1157_v5  ;;  %s1117_s22 = scalar_lea.vmem %s3150_s26, %s2934_s1  ;;  %s1285_s26 = sshll.u32 %s1105_s0, 4  ;;  %s3023_s26 = int_to_ptr.vmem [resolvable:$true] %s1285_s26 }
 0x1bf   : > { %v2973_v40 = vld [vmem:[%s1117_s22] sm:$0xff]  ;;  %s1736_s22 = sshll.u32 %s3145_s6, 7 }
 0x1c2   : > { %s1113_s13 = scalar_lea.vmem %s3147_s27, %s2934_s1  ;;  %s1121_s27 = scalar_lea.vmem %s3152_s2, %s2934_s1 }
 0x1c3   : > { %v1131_v20 = vld [vmem:[%s1113_s13] sm:$0xff]  ;;  %s3153_s13 = scalar_lea.vmem [#allocation20], %s2873_s18  ;;  %s3154_s1 = scalar_lea.vmem [#allocation13], %s2873_s18 }
 0x1c4   : > { %v1143_v24 = vmul.f32 %v1142_v13, %v1131_v20  ;;  %v1152_v29 = vmul.f32 %v2962_v21, %v1131_v20  ;;  %v1139_v62 = vld [vmem:[%s1121_s27] sm:$0xff]  ;;  %v2986_v2 = vld [vmem:[%s3153_s13] sm:$0xff]  ;;  %s3029_s2 = scalar_lea.hbm %s3161_s23, %s1736_s22  ;;  %s1272_s27 = scalar_lea.sflag [#allocation4], %s2870_s3 }
 0x1c5   : > { %v1130_v13 = vld [vmem:[%s3156_s20] sm:$0xff]  ;;  %s2222_s13 = scalar_lea.vmem %s3023_s26, 128  ;;  %p3162_p11 = scmp.ne.s32.totalorder %s3160_s19, 0 }
 0x1c6   : > { %p2223_p10 = scmp.ne.s32.totalorder %s3023_s26, %s2222_s13  ;;  %s2332_s18 = smov [#allocation25]  }
 0x1c7   : > { %v1807_v7 = vpop.eup %1806  ;;  %s2226_s6 = sshll.u32 %s2332_s18, 4  ;;  %s2227_s6 = int_to_ptr.vmem [resolvable:$false] %s2226_s6 }
 0x1c8   : > { %v1145_v8 = vmul.f32 %v1807_v7, %v1134_v6  ;;  %v1809_v17 = vpop.eup %1808  ;;  %v1212_v7 = vmax.f32 %v2986_v2, 1e-06  ;;  %p2224_p4 = pnand %p2223_p10, %p3162_p11  ;;  %p2229_p7 = scmp.lt.s32.totalorder %s3023_s26, %s2227_s6 }
 0x1c9   : > { %v1159_v22 = vmul.f32 %v1809_v17, %v1154_v16 }
 0x1ca   : > { %v1146_v11 = vadd.f32 1.0, %v1145_v8  ;;  %p2225_p3 = pneg %p2224_p4 }
 0x1cb   : > { %v1160_v25 = vmul.f32 %v1159_v22, %v2959_v19 }
 0x1cc   : > { %v1147_v12 = vmul.f32 %v1146_v11, %v1126_v9  ;;  %v2991_v9 = vld [vmem:[%s3154_s1] sm:$0xff]  ;;  %s2228_s1 = scalar_lea.vmem %s2227_s6, 256 }
 0x1cd   : > { %v1163_v31 = vadd.f32 %v1162_v26, %v1160_v25  ;;  %v1227_v16 = vmul.f32 %v1139_v62, %v2991_v9  ;;  %p2230_p1 = scmp.lt.s32.totalorder %s2228_s1, %s2222_s13 }
 0x1ce   : > { %v1148_v15 = vadd.f32 %v1147_v12, %v2942_v1  ;;  %v1133_v12 = vld [vmem:[%s3155_s29] sm:$0xff] }
 0x1cf   : > { %v1234_v20 = vmul.f32 %v1133_v12, %v1133_v12  ;;  %p2231_p8 = por %p2230_p1, %p2229_p7 }
 0x1d0   : > { %1810 = vrcp.f32 %v1148_v15 }
 0x1d1   : > { %p2232_p12 = pnand %p2231_p8, %p2225_p3 }
 0x1da   : > { %v1811_v27 = vpop.eup %1810 }
 0x1db   : > { %v1150_v28 = vmul.f32 %v1811_v27, %v1143_v24 }
 0x1dd   : > { %v1151_v30 = vmul.f32 %v1150_v28, %v2959_v19 }
 0x1df   : > { %v1153_v32 = vadd.f32 %v1152_v29, %v1151_v30  ;;  %v1125_v29 = vld [vmem:[%s3157_s9] sm:$0xff] }
 0x1e0   : > { %v1232_v18 = vmul.f32 %v1125_v29, %v1125_v29 }
 0x1e1   : > { %v1168_v33 = vadd.f32 %v1163_v31, %v1153_v32  ;;  %v1170_v34 = vmul.f32 %v1163_v31, %v1153_v32  ;;  %v1233_v32 = vmul.f32 2.0, %v1125_v29 }
 0x1e3   : > { %v1169_v35 = vsub.f32 0.0, %v1168_v33  ;;  %v1172_v36 = vmul.f32 3.996, %v1170_v34 }
 0x1e5   : > { %v1171_v37 = vmul.f32 %v1169_v35, %v1169_v35  ;;  %v1175_v45 = vsub.f32 0.0, %v1169_v35 }
 0x1e7   : > { %v1173_v38 = vsub.f32 %v1171_v37, %v1172_v36 }
 0x1e9   : > { %v1174_v39 = vmax.f32 %v1173_v38, 0.0 }
 0x1eb   : > { %1812 = vrsqrt.f32 %v1174_v39  ;;  %vm1178_vm0 = vcmp.eq.f32.partialorder %v1174_v39, inf  ;;  %v1181_v44 = vand.u32 2147483648, %v1174_v39  ;;  %vm1180_vm1 = vcmp.eq.f32.partialorder %v1174_v39, 0.0 }
 0x1ec   : > { %1814 = vrcp.f32 %v2973_v40 }
 0x1f5   : > { %v1813_v42 = vpop.eup %1812 }
 0x1f6   : > { %v1177_v46 = vmul.f32 %v1813_v42, %v1174_v39  ;;  %v1815_v49 = vpop.eup %1814 }
 0x1f7   : > { %v1167_v52 = vmul.f32 %v1815_v49, %v1165_v47 }
 0x1f8   : > { %v1179_v48 = vsel %vm1178_vm0, %v1174_v39, %v1177_v46 }
 0x1f9   : > { %v1182_v50 = vsel %vm1180_vm1, %v1181_v44, %v1179_v48 }
 0x1fa   : > { %v1183_v51 = vsub.f32 %v1175_v45, %v1182_v50 }
 0x1fc   : > { %v1184_v53 = vmul.f32 0.5005005, %v1183_v51 }
 0x1fe   : > { %v1185_v54 = vmul.f32 %v1184_v53, %v2962_v21  ;;  %v1186_v10 = vmul.f32 %v1184_v53, %v2959_v19  ;;  %v1210_v19 = vsub.f32 0.0, %v1130_v13 }
 0x200   : > { %v1187_v55 = vadd.f32 %v1185_v54, %v1167_v52  ;;  %v1189_v56 = vmul.f32 %v1185_v54, %v1167_v52 }
 0x202   : > { %v1188_v57 = vsub.f32 0.0, %v1187_v55  ;;  %v1191_v58 = vmul.f32 3.996, %v1189_v56 }
 0x204   : > { %v1190_v59 = vmul.f32 %v1188_v57, %v1188_v57  ;;  %v1194_v3 = vsub.f32 0.0, %v1188_v57 }
 0x206   : > { %v1192_v60 = vsub.f32 %v1190_v59, %v1191_v58 }
 0x208   : > { %v1193_v61 = vmax.f32 %v1192_v60, 0.0 }
 0x20a   : > { %1816 = vrsqrt.f32 %v1193_v61  ;;  %vm1197_vm2 = vcmp.eq.f32.partialorder %v1193_v61, inf  ;;  %v1200_v0 = vand.u32 2147483648, %v1193_v61  ;;  %vm1199_vm3 = vcmp.eq.f32.partialorder %v1193_v61, 0.0 }
 0x20b   : > { %1818 = vrcp.f32 %v1139_v62 }
 0x20c   : > { %1820 = vrcp.f32 %v1212_v7 }
 0x20d   : > { %1822 = vrcp.f32 %v1227_v16 }
 0x214   : > { %v1817_v63 = vpop.eup %1816 }
 0x215   : > { %v1196_v4 = vmul.f32 %v1817_v63, %v1193_v61  ;;  %v1819_v22 = vpop.eup %1818 }
 0x216   : > { %v1236_v25 = vmul.f32 %v1819_v22, %v1234_v20  ;;  %v1821_v28 = vpop.eup %1820 }
 0x217   : > { %v1198_v5 = vsel %vm1197_vm2, %v1193_v61, %v1196_v4  ;;  %v1823_v36 = vpop.eup %1822  ;;  %v1262_v61 = vmul.f32 1.6, %v2991_v9 }
 0x218   : > { %v1201_v6 = vsel %vm1199_vm3, %v1200_v0, %v1198_v5  ;;  %v1237_v30 = vsub.f32 1.0, %v1236_v25 }
 0x219   : > { %v1202_v8 = vsub.f32 %v1194_v3, %v1201_v6 }
 0x21b   : > { %v1203_v11 = vmul.f32 0.5005005, %v1202_v8 }
 0x21d   : > { %v1204_v15 = vmul.f32 %v1203_v11, %v2962_v21 }
 0x21f   : > { %v1205_v17 = vadd.f32 %v1204_v15, %v1186_v10 }
 0x221   : > { %v1206_v23 = vsub.f32 %v1205_v17, %v1130_v13 }
 0x223   : > { %v1208_v24 = vsel %vm1207_vm4, %v1206_v23, 0.0 }
 0x224   : > { %v1211_v26 = vsel %vm1209_vm5, %v1210_v19, %v1208_v24 }
 0x225   : > { %v1219_v27 = vmul.f32 1.6, %v1211_v26  ;;  %vm1256_vm6 = vcmp.lt.f32.partialorder %v1211_v26, 0.0  ;;  %v1260_v0 = vmul.f32 %v1211_v26, %v2973_v40 }
 0x227   : > { %v1220_v21 = vmul.f32 %v1219_v27, %v2973_v40 }
 0x229   : > { %v1222_v31 = vmul.f32 %v1821_v28, %v1220_v21 }
 0x22b   : > { %v1223_v33 = vmul.f32 %v1222_v31, %v1133_v12  ;;  %v1224_v34 = vadd.f32 %v1222_v31, %v1125_v29  ;;  %v1238_v35 = vmul.f32 %v1237_v30, %v1222_v31 }
 0x22d   : > { %v1225_v37 = vmul.f32 2.0, %v1224_v34  ;;  %v1226_v38 = vmul.f32 %v1223_v33, %v1223_v33  ;;  %v1239_v39 = vadd.f32 %v1238_v35, %v1233_v32 }
 0x22f   : > { %v1229_v41 = vmul.f32 %v1823_v36, %v1226_v38  ;;  %v1240_v42 = vmul.f32 %v1239_v39, %v1222_v31 }
 0x231   : > { %v1230_v43 = vadd.f32 %v1229_v41, %v1225_v37  ;;  %v1241_v44 = vadd.f32 %v1240_v42, %v1232_v18 }
 0x233   : > { %v1231_v45 = vsub.f32 0.0, %v1230_v43  ;;  %v1243_v46 = vmul.f32 4.0, %v1241_v44 }
 0x235   : > { %v1242_v47 = vmul.f32 %v1231_v45, %v1231_v45  ;;  %v1245_v53 = vsub.f32 0.0, %v1231_v45 }
 0x237   : > { %v1244_v48 = vsub.f32 %v1242_v47, %v1243_v46 }
 0x239   : > { %v1246_v49 = vmax.f32 %v1244_v48, 0.0  ;;  %vm1257_vm7 = vcmp.lt.f32.partialorder %v1244_v48, 0.0 }
 0x23a   : > { %vm3008_vm8 = vmor %vm1256_vm6, %vm1257_vm7 }
 0x23b   : > { %1824 = vrsqrt.f32 %v1246_v49  ;;  %vm1249_vm9 = vcmp.eq.f32.partialorder %v1246_v49, inf  ;;  %v1252_v52 = vand.u32 2147483648, %v1246_v49  ;;  %vm1251_vm10 = vcmp.eq.f32.partialorder %v1246_v49, 0.0 }
 0x23c   : > { %1826 = vrcp.f32 %v2991_v9 }
 0x245   : > { %v1825_v51 = vpop.eup %1824 }
 0x246   : > { %v1248_v54 = vmul.f32 %v1825_v51, %v1246_v49  ;;  %v1827_v55 = vpop.eup %1826 }
 0x247   : > { %v1214_v58 = vmul.f32 1.4, %v1827_v55 }
 0x248   : > { %v1250_v56 = vsel %vm1249_vm9, %v1246_v49, %v1248_v54 }
 0x249   : > { %v1253_v57 = vsel %vm1251_vm10, %v1252_v52, %v1250_v56  ;;  %v1215_v62 = vmul.f32 %v1214_v58, %v1211_v26 }
 0x24a   : > { %v1254_v59 = vadd.f32 %v1253_v57, %v1245_v53 }
 0x24b   : > { %v1216_v6 = vmul.f32 %v1215_v62, %v2973_v40 }
 0x24c   : > { %v1255_v60 = vmul.f32 0.5, %v1254_v59 }
 0x24d   : > { %v1217_v10 = vadd.f32 %v1216_v6, %v1212_v7 }
 0x24e   : > { %v1259_v63 = vsel %vm3008_vm8, %v1125_v29, %v1255_v60 }
 0x24f   : > { %v1261_v3 = vmul.f32 1.4, %v1259_v63  ;;  %v1265_v4 = vmul.f32 %v1259_v63, %v2991_v9  ;;  %v1218_v11 = vmax.f32 %v1217_v10, 1e-06 }
 0x251   : > { %v1263_v5 = vadd.f32 %v1262_v61, %v1261_v3  ;;  %1828 = vrcp.f32 %v1265_v4 }
 0x253   : > { %v1264_v8 = vmul.f32 %v1263_v5, %v1260_v0 }
 0x25b   : > { %v1829_v12 = vpop.eup %1828 }
 0x25c   : > { %v1267_v13 = vmul.f32 %v1829_v12, %v1264_v8 }
 0x25e   : > { %v1268_v14 = vsub.f32 %v1218_v11, %v1267_v13 }
 0x260   : > { %v1269_v9 = vsub.f32 %v2942_v1, %v1268_v14 }
 0x262   : > { %1270 = vst [vmem:[%s1105_s0] sm:$0xff] %v1269_v9 }
 0x263   : > { %2235 = shalt.err (!%p2232_p12)
}
 0x264   : > { %s2236_s3 = scalar_lea.hbm %s3029_s2, 128  ;;  %s2240_s9 = scalar_lea.hbm %s3161_s23, 256 }
 0x265   : > { %p2237_p0 = scmp.ne.s32.totalorder %s3029_s2, %s2236_s3  ;;  %p2241_p9 = scmp.lt.u32.totalorder %s3029_s2, %s3161_s23 }
 0x266   : > { %p2242_p2 = scmp.lt.u32.totalorder %s2240_s9, %s2236_s3  ;;  %p2244_p10 = scmp.lt.u32.totalorder %s2236_s3, %s3029_s2 }
 0x267   : > { %p2238_p13 = pnand %p2237_p0, %p3162_p11 }
 0x268   : > { %p2243_p5 = por %p2242_p2, %p2241_p9 }
 0x269   : > { %p2239_p6 = pneg %p2238_p13 }
 0x26a   : > { %p2245_p4 = por %p2244_p10, %p2243_p5 }
 0x26c   : > { %p2246_p3 = pnand %p2245_p4, %p2239_p6 }
 0x26e   : > { %2249 = shalt.err (!%p2246_p3)
}
 0x26f   : > { %1767 = dma.vmem_to_hbm [thread:$0]  (%p3162_p11), %s3023_s26, 128, %s3029_s2, %s1272_s27  }
 0x270 PF: > { %s3163_s24 = sld [smem:[#allocation35_spill]]  ;;  %s3164_s21 = sld [smem:[#allocation41_spill]] }
 0x271   : > { %p3166_p1 = scmp.ge.s32.totalorder %s2316_s30, 2 }
 0x276   : > { %s1297_s13 = sand.u32 1, %s3163_s24   ;;  %p3165_p7 = scmp.ne.s32.totalorder %s3164_s21, 0 }
 0x277   : > { %s1298_s18 = scalar_lea.sflag [#allocation4], %s1297_s13 }
 0x278   : > { %p1770_p8 = pnand %p3166_p1, %p3165_p7 }
 0x27a   : > { %2299 = dma.done.wait (!%p1770_p8), %s1298_s18, 128  }
 0x27b   : > { %2301 = vsyncadd (!%p1770_p8), %s1298_s18, 4294967168  ;;  %s3167_s30 = sld [smem:[#allocation38_spill]]  ;;  %s3168_s6 = sld [smem:[#allocation36_spill]] }
 0x27c   : > { %s3169_s29 = sld [smem:[#allocation39_spill]]  ;;  %s3170_s27 = smov %s2308_s28 }
 0x281   : > { %p52_p12 = scmp.ge.s32.totalorder %s3167_s30, 4   ;;  %s3171_s28 = smov %s3168_s6 }
 0x283   :  { %54 = sbr.rel (!%p52_p12) target bundleno = 30 (0x1e), region = 306 }
 0x28a   :  { %1303 = vsyncpa [#allocation3], 1 }
 0x28b   :  { %1305 = vsyncpa [#allocation3 + $0x1], 1 }
 0x28c   :  { %1306 = vsyncpa [#allocation6], 1 }
 0x28d   :  { %1308 = vsyncpa [#allocation6 + $0x1], 1 }
 0x28e   :  { %1309 = vsyncpa [#allocation9], 1 }
 0x28f   :  { %1311 = vsyncpa [#allocation9 + $0x1], 1 }
 0x290   :  { %1312 = vsyncpa [#allocation12], 1 }
 0x291   :  { %1314 = vsyncpa [#allocation12 + $0x1], 1 }
 0x292   :  { %1315 = vsyncpa [#allocation15], 1 }
 0x293   :  { %1317 = vsyncpa [#allocation15 + $0x1], 1 }
 0x294   :  { %1318 = vsyncpa [#allocation18], 1 }
 0x295   :  { %1320 = vsyncpa [#allocation18 + $0x1], 1 }
 0x296   :  { %1321 = vsyncpa [#allocation21], 1 }
 0x297   :  { %1323 = vsyncpa [#allocation21 + $0x1], 1 }
 0x298   :  { %1324 = vsyncpa [#allocation24], 1 }
 0x299   :  { %1326 = vsyncpa [#allocation24 + $0x1], 1 }
 0x29a   :  { %1327 = vsyncpa [#allocation4], 1 }
 0x29b   :  { %1329 = vsyncpa [#allocation4 + $0x1], 1 }

</bundles_post_ra>
